<compile_context>
chip_gen: v6e
topology: v6e:2x2x1
jax: 0.10.0
libtpu: 0.0.40
codegen_flags: <defaults>
</compile_context>

<pallas_src>
import jax
import jax.numpy as jnp
from jax import lax
from jax.experimental import pallas as pl
from jax.experimental.pallas import tpu as pltpu


# ---------------------------------------------------------------------------
# Parameter init (deterministic, PyTorch-Linear-like uniform(-1/sqrt(fan_in)))
# ---------------------------------------------------------------------------
def _lin_init(key, d_in, d_out):
    bound = 1.0 / (d_in ** 0.5)
    kw, kb = jax.random.split(key)
    w = jax.random.uniform(kw, (d_in, d_out), jnp.float32, -bound, bound)
    b = jax.random.uniform(kb, (1, d_out), jnp.float32, -bound, bound)
    return w, b


def init_params(key, input_dim, attention_dim, max_hops):
    D, A = input_dim, attention_dim
    assert A == D, "kernel assumes attention_dim == input_dim"
    H = D // 2
    ks = jax.random.split(key, 12)
    p = {}
    # EnhancedAttentionHead2D
    p["wq"], p["bq"] = _lin_init(ks[0], D, A)
    p["wk"], p["bk"] = _lin_init(ks[1], D, A)
    p["wv"], p["bv"] = _lin_init(ks[2], D, A)
    # context_weight / diversity / confidence layers (stacked Linear(A,1) x 3)
    p["wks"], p["bks"] = _lin_init(ks[3], A, 3)
    # EnhancedTreeHopNode
    p["wab"], p["bab"] = _lin_init(ks[4], D, 2)          # alpha | beta (stacked)
    p["wg1"], p["bg1"] = _lin_init(ks[5], 2 * D, D)      # update_gate[0]
    p["wg2"], p["bg2"] = _lin_init(ks[6], D, D)          # update_gate[2]
    p["wrne"], p["brne"] = _lin_init(ks[7], D, 3)        # relevance/novelty/entity
    p["wc1"], p["bc1"] = _lin_init(ks[8], D, H)          # confidence_estimator[0]
    p["wc2"], p["bc2"] = _lin_init(ks[9], H, 1)          # confidence_estimator[2]
    # TreeHopEnhanced.hop_predictor
    p["wh1"], p["bh1"] = _lin_init(ks[10], D, H)
    p["wh2"], p["bh2"] = _lin_init(ks[11], H, max_hops)
    return p


def _pad_cols(w, b, to):
    width = w.shape[1]
    padded = ((width + to - 1) // to) * to
    if padded == width:
        return w, b
    pad = padded - width
    return jnp.pad(w, ((0, 0), (0, pad))), jnp.pad(b, ((0, 0), (0, pad)))


def pack_params(p, *, weight_dtype=jnp.bfloat16, lane_pad=128):
    """Pack the Linear params into wide, lane-aligned slabs for the kernel.

    weight matrices -> `weight_dtype` (bf16 halves weight VMEM / DMA; MXU is
    bf16 native); biases and the VPU-side wc2 row stay f32.
    """
    D = p["wq"].shape[0]
    wg1_top, wg1_bot = p["wg1"][:D], p["wg1"][D:]        # q-half / ctx-half of gate L0
    # fold key-weighting layers into the ctx matmul:
    #   kw = sigmoid((ctx@wk + bk)@wks + bks) = sigmoid(ctx@(wk@wks) + (bk@wks + bks))
    wkw = p["wk"] @ p["wks"]                             # [D, 3]
    bkw = p["bk"] @ p["wks"] + p["bks"]                  # [1, 3]

    # q-sourced slab: [wq | wg1_top | wh1]   (bg1 folded into the ctx side)
    wqs = jnp.concatenate([p["wq"], wg1_top, p["wh1"]], axis=1)
    bqs = jnp.concatenate([p["bq"], jnp.zeros_like(p["bg1"]), p["bh1"]], axis=1)
    # ctx-sourced slab, wide slices first (lane-aligned): [wk | wv | wg1_bot | wkw | wab]
    wcs = jnp.concatenate([p["wk"], p["wv"], wg1_bot, wkw, p["wab"]], axis=1)
    bcs = jnp.concatenate([p["bk"], p["bv"], p["bg1"], bkw, p["bab"]], axis=1)
    # h-sourced slab, wide slice first: [wc1 | wrne]
    whs = jnp.concatenate([p["wc1"], p["wrne"]], axis=1)
    bhs = jnp.concatenate([p["bc1"], p["brne"]], axis=1)

    wqs, bqs = _pad_cols(wqs, bqs, lane_pad)
    wcs, bcs = _pad_cols(wcs, bcs, lane_pad)
    whs, bhs = _pad_cols(whs, bhs, lane_pad)

    wd = weight_dtype
    return {
        "wqs": wqs.astype(wd), "bqs": bqs,
        "wcs": wcs.astype(wd), "bcs": bcs,
        "wg2": p["wg2"].astype(wd), "bg2": p["bg2"],
        "whs": whs.astype(wd), "bhs": bhs,
        "wc2r": p["wc2"].T,                # [1, H] row, f32 (VPU lane-reduce path)
        "bc2": p["bc2"],
        "wh2": p["wh2"].astype(wd), "bh2": p["bh2"],
    }


_PACKED_NAMES = ["wqs", "bqs", "wcs", "bcs", "wg2", "bg2",
                 "whs", "bhs", "wc2r", "bc2", "wh2", "bh2"]

_HEADS_W = 8   # packed scalar-heads slab: alpha|beta|rel|nov|ent|conf|pad|pad


# ---------------------------------------------------------------------------
# Fused Pallas kernel
# ---------------------------------------------------------------------------
def _treehop_fused_kernel(
    q_ref, ctx_ref,
    wqs_ref, bqs_ref, wcs_ref, bcs_ref, wg2_ref, bg2_ref,
    whs_ref, bhs_ref, wc2r_ref, bc2_ref, wh2_ref, bh2_ref,
    h_ref, gate_ref, heads_ref, hop_ref, uq_ref,
):
    f32 = jnp.float32
    bf16 = jnp.bfloat16
    Bt, N, D = ctx_ref.shape
    A = D                                   # attention_dim == input_dim (wrapper asserts)
    H = wc2r_ref.shape[1]
    CW = wcs_ref.shape[1]
    HW = whs_ref.shape[1]
    heads_w = heads_ref.shape[-1]

    q = q_ref[...]                                        # [Bt, D]   f32
    ctx3 = ctx_ref[...]                                   # [Bt, N, D] f32

    # ---- q-sourced projections: one wide MXU call  [wq | wg1_top | wh1]
    qproj = jnp.dot(q.astype(bf16), wqs_ref[...],
                    preferred_element_type=f32) + bqs_ref[...]
    Q = qproj[:, :A]                                      # [Bt, A]
    g_lin = qproj[:, A:A + D]                             # [Bt, D]  (q @ wg1_top)
    hop_hidden = jnp.maximum(qproj[:, A + D:A + D + H], 0.0)   # [Bt, H]

    # ---- ctx-sourced projections: one wide MXU call  [wk | wv | wg1_bot | wk@wks | wab]
    cproj = (jnp.dot(ctx3.reshape(Bt * N, D).astype(bf16), wcs_ref[...],
                     preferred_element_type=f32) + bcs_ref[...]).reshape(Bt, N, CW)
    K3 = cproj[..., :A]                                   # [Bt, N, A]
    V3 = cproj[..., A:2 * A]                              # [Bt, N, A]
    g_pre3 = cproj[..., 2 * A:2 * A + D]                  # [Bt, N, D]  ctx@wg1_bot + bg1
    tail = jax.nn.sigmoid(cproj[..., 2 * A + D:2 * A + D + 5])  # kw0|kw1|kw2|alpha|beta
    combined3 = tail[..., 0:1] * tail[..., 1:2] * tail[..., 2:3]   # [Bt, N, 1]
    alpha3 = tail[..., 3:4]
    beta3 = tail[..., 4:5]

    # ---- attention (all query rows identical -> one score per key row).
    #      VPU mul + lane/sublane reduces; no tiny batched MXU matmuls.
    scores3 = jnp.sum(Q[:, None, :] * (K3 * combined3), axis=-1, keepdims=True)  # [Bt,N,1]
    m = jnp.max(scores3, axis=1, keepdims=True)
    e = jnp.exp(scores3 - m)
    attn3 = e * pl.reciprocal(jnp.sum(e, axis=1, keepdims=True), approx=True)
    O3 = jnp.sum(attn3 * V3, axis=1, keepdims=True)                              # [Bt,1,A]

    # ---- update gate (concat-free; q-half precomputed once per batch row)
    g_hidden = jnp.maximum(g_pre3 + g_lin[:, None, :], 0.0).reshape(Bt * N, D)
    gate3 = jax.nn.sigmoid(
        jnp.dot(g_hidden.astype(bf16), wg2_ref[...], preferred_element_type=f32)
        + bg2_ref[...]).reshape(Bt, N, D)

    # ---- h mix (gamma == beta, per the module)
    h3 = (alpha3 * q[:, None, :] - beta3 * ctx3 + beta3 * O3) * gate3            # [Bt,N,D]

    # ---- scoring heads: one wide MXU call [wc1 | wrne]; conf dot on the VPU
    hproj = (jnp.dot(h3.reshape(Bt * N, D).astype(bf16), whs_ref[...],
                     preferred_element_type=f32) + bhs_ref[...]).reshape(Bt, N, HW)
    c_hidden3 = jnp.maximum(hproj[..., :H], 0.0)
    rne3 = jax.nn.sigmoid(hproj[..., H:H + 3])
    conf3 = jax.nn.sigmoid(
        jnp.sum(c_hidden3 * wc2r_ref[...][None, :, :], axis=-1, keepdims=True)
        + bc2_ref[...])

    # ---- hop predictor (fused; q already resident in VMEM)
    logits = jnp.dot(hop_hidden.astype(bf16), wh2_ref[...],
                     preferred_element_type=f32) + bh2_ref[...]
    lm = jnp.max(logits, axis=-1, keepdims=True)
    le = jnp.exp(logits - lm)
    hop_ref[...] = le * pl.reciprocal(jnp.sum(le, axis=-1, keepdims=True), approx=True)

    # ---- best passage (first argmax of confidence) -> updated_query, in-kernel
    row_id = lax.broadcasted_iota(jnp.int32, (Bt, N, 1), 1)
    cmax = jnp.max(conf3, axis=1, keepdims=True)
    first_max = jnp.min(jnp.where(conf3 == cmax, row_id, N), axis=1, keepdims=True)
    sel = row_id == first_max
    uq_ref[...] = jnp.sum(jnp.where(sel, h3, 0.0), axis=1)                        # [Bt, D]

    # ---- stores (h / gate in bf16 halve output bandwidth; heads packed)
    h_ref[...] = h3.astype(h_ref.dtype)
    gate_ref[...] = gate3.astype(gate_ref.dtype)
    parts = [alpha3, beta3, rne3, conf3]
    n_pad = heads_w - 6
    if n_pad > 0:
        parts.append(jnp.zeros((Bt, N, n_pad), f32))
    heads_ref[...] = jnp.concatenate(parts, axis=-1)


# ---------------------------------------------------------------------------
# Wrapper
# ---------------------------------------------------------------------------
def treehop_enhanced_forward(packed, query_embedding, selected_embeddings, *, block_b=None):
    """Neural hot path of TreeHopEnhanced.forward for one hop (one pallas_call)."""
    B, D = query_embedding.shape
    Bc, N, Dc = selected_embeddings.shape
    assert Bc == B and Dc == D
    assert packed["wg2"].shape == (D, D), "kernel assumes attention_dim == input_dim"
    max_hops = packed["wh2"].shape[1]

    # --- batch block: multiple of 8 sublanes, aim for bt*N >= 256 MXU rows,
    #     but keep >= 2 grid steps when the batch allows (v7x has 2 TCs).
    if block_b is not None:
        bt = max(8, ((block_b + 7) // 8) * 8)
    else:
        bt = 8
        while bt * N < 256 and bt < 256:
            bt *= 2
        while bt > 8 and pl.cdiv(B, bt) < 2:
            bt //= 2
    grid_b = pl.cdiv(B, bt)
    B_pad = grid_b * bt
    if B_pad != B:
        q_in = jnp.pad(query_embedding, ((0, B_pad - B), (0, 0)))
        ctx_in = jnp.pad(selected_embeddings, ((0, B_pad - B), (0, 0), (0, 0)))
    else:
        q_in, ctx_in = query_embedding, selected_embeddings

    weights = [packed[n] for n in _PACKED_NAMES]
    # constant weights: index_map never changes -> single buffer (no 2x VMEM)
    w_spec = lambda w: pl.BlockSpec(w.shape, lambda b: (0, 0),
                                    pipeline_mode=pl.Buffered(1))
    in_specs = [
        pl.BlockSpec((bt, D), lambda b: (b, 0)),             # q block
        pl.BlockSpec((bt, N, D), lambda b: (b, 0, 0)),        # ctx block
    ] + [w_spec(w) for w in weights]

    out_specs = (
        pl.BlockSpec((bt, N, D), lambda b: (b, 0, 0)),            # h (bf16)
        pl.BlockSpec((bt, N, D), lambda b: (b, 0, 0)),            # update_gate (bf16)
        pl.BlockSpec((bt, N, _HEADS_W), lambda b: (b, 0, 0)),     # packed scalar heads
        pl.BlockSpec((bt, max_hops), lambda b: (b, 0)),           # hop probs
        pl.BlockSpec((bt, D), lambda b: (b, 0)),                  # updated_query
    )
    out_shape = (
        jax.ShapeDtypeStruct((B_pad, N, D), jnp.bfloat16),
        jax.ShapeDtypeStruct((B_pad, N, D), jnp.bfloat16),
        jax.ShapeDtypeStruct((B_pad, N, _HEADS_W), jnp.float32),
        jax.ShapeDtypeStruct((B_pad, max_hops), jnp.float32),
        jax.ShapeDtypeStruct((B_pad, D), jnp.float32),
    )

    # explicit scoped-VMEM budget: single-buffered weights + double-buffered I/O
    w_bytes = sum(int(w.size) * w.dtype.itemsize for w in weights)
    io_bytes = 2 * (bt * D * 4 + bt * N * D * 4              # inputs (f32)
                    + 2 * bt * N * D * 2                      # h / gate (bf16)
                    + bt * N * _HEADS_W * 4 + bt * max_hops * 4 + bt * D * 4)
    vmem_limit = int(min(max(32 << 20, 2 * (w_bytes + io_bytes) + (4 << 20)), 96 << 20))

    h, gate, heads, hop_probs, updated_query = pl.pallas_call(
        _treehop_fused_kernel,
        grid=(grid_b,),
        in_specs=in_specs,
        out_specs=out_specs,
        out_shape=out_shape,
        compiler_params=pltpu.CompilerParams(
            dimension_semantics=("parallel",),
            vmem_limit_bytes=vmem_limit),
    )(q_in, ctx_in, *weights)

    if B_pad != B:
        h, gate, heads = h[:B], gate[:B], heads[:B]
        hop_probs, updated_query = hop_probs[:B], updated_query[:B]

    conf = heads[..., 5:6]
    best_idx = jnp.argmax(conf[..., 0], axis=-1)
    return {
        "hop_probs": hop_probs,
        "predicted_hops": jnp.argmax(hop_probs, axis=-1) + 1,
        "h": h,
        "updated_query": updated_query,
        "update_gate": gate,
        "alpha_weights": heads[..., 0:1],
        "beta_weights": heads[..., 1:2],
        "gamma_weights": heads[..., 1:2],          # gamma == beta (per the module)
        "relevance_scores": heads[..., 2:3],
        "novelty_scores": heads[..., 3:4],
        "entity_scores": heads[..., 4:5],
        "confidence_scores": conf,
        "best_idx": best_idx,
    }


# ---------------------------------------------------------------------------
# Plain-JAX reference (for validation; pure f32)
# ---------------------------------------------------------------------------
def _ref_forward(p, q, ctx):
    B, N, D = ctx.shape
    qx = jnp.broadcast_to(q[:, None, :], (B, N, D))
    hdn = jnp.maximum(q @ p["wh1"] + p["bh1"], 0.0)
    hop_probs = jax.nn.softmax(hdn @ p["wh2"] + p["bh2"], axis=-1)

    Q = qx @ p["wq"] + p["bq"]
    K = ctx @ p["wk"] + p["bk"]
    V = ctx @ p["wv"] + p["bv"]
    QK = jnp.einsum("bud,bvd->buv", Q, K)
    kw = jax.nn.sigmoid(K @ p["wks"] + p["bks"])
    combined = kw[..., 0] * kw[..., 1] * kw[..., 2]
    QK = QK * combined[:, None, :]
    Aw = jax.nn.softmax(QK, axis=-1)
    O = jnp.einsum("buv,bvd->bud", Aw, V)

    ab = jax.nn.sigmoid(ctx @ p["wab"] + p["bab"])
    alpha, beta = ab[..., 0:1], ab[..., 1:2]
    gate_in = jnp.concatenate([qx, ctx], axis=-1)
    gate = jax.nn.sigmoid(
        jnp.maximum(gate_in @ p["wg1"] + p["bg1"], 0.0) @ p["wg2"] + p["bg2"])
    h = (alpha * qx - beta * ctx + beta * O) * gate
    rne = jax.nn.sigmoid(h @ p["wrne"] + p["brne"])
    conf = jax.nn.sigmoid(
        jnp.maximum(h @ p["wc1"] + p["bc1"], 0.0) @ p["wc2"] + p["bc2"])
    return hop_probs, h, gate, ab, rne, conf


# ---------------------------------------------------------------------------
if __name__ == "__main__":
    B, N, D, MAX_HOPS = 2, 8, 32, 5

    key = jax.random.PRNGKey(0)
    kp, kq, kc = jax.random.split(key, 3)
    params = init_params(kp, input_dim=D, attention_dim=D, max_hops=MAX_HOPS)
    packed = pack_params(params)                       # bf16 weight slabs

    query_embedding = jax.random.normal(kq, (B, D), jnp.float32)
    selected_embeddings = jax.random.normal(kc, (B, N, D), jnp.float32)

    out = treehop_enhanced_forward(packed, query_embedding, selected_embeddings)
    out = jax.block_until_ready(out)

    # sanity check against a pure-JAX f32 reference (bf16 weights + approx
    # reciprocal softmax -> compare at 3e-2)
    ref_hop, ref_h, ref_gate, ref_ab, ref_rne, ref_conf = _ref_forward(
        params, query_embedding, selected_embeddings)
    tol = dict(atol=3e-2, rtol=3e-2)
    checks = [
        (out["hop_probs"], ref_hop),
        (out["h"].astype(jnp.float32), ref_h),
        (out["update_gate"].astype(jnp.float32), ref_gate),
        (jnp.concatenate([out["alpha_weights"], out["beta_weights"]], -1), ref_ab),
        (jnp.concatenate([out["relevance_scores"], out["novelty_scores"],
                          out["entity_scores"]], -1), ref_rne),
        (out["confidence_scores"], ref_conf),
    ]
    for got, want in checks:
        assert got.shape == want.shape, (got.shape, want.shape)
        assert jnp.allclose(got, want, **tol), float(jnp.max(jnp.abs(got - want)))

    # updated_query must equal h gathered at the kernel's own best_idx
    # (robust to near-tie argmax differences vs. the f32 reference)
    ref_uq_at_sel = jnp.take_along_axis(
        ref_h, out["best_idx"][:, None, None], axis=1)[:, 0, :]
    assert out["updated_query"].shape == ref_uq_at_sel.shape
    assert jnp.allclose(out["updated_query"], ref_uq_at_sel, **tol), float(
        jnp.max(jnp.abs(out["updated_query"] - ref_uq_at_sel)))

    print("KERNEL_OK")
</pallas_src>

<mosaic_0001>
module attributes {stable_mosaic.version = 11 : i64} {
  func.func @_treehop_fused_kernel(%arg0: i32, %arg1: memref<8x32xf32, #tpu.memory_space<vmem>>, %arg2: memref<8x8x32xf32, #tpu.memory_space<vmem>>, %arg3: memref<32x128xbf16, #tpu.memory_space<vmem>>, %arg4: memref<1x128xf32, #tpu.memory_space<vmem>>, %arg5: memref<32x128xbf16, #tpu.memory_space<vmem>>, %arg6: memref<1x128xf32, #tpu.memory_space<vmem>>, %arg7: memref<32x32xbf16, #tpu.memory_space<vmem>>, %arg8: memref<1x32xf32, #tpu.memory_space<vmem>>, %arg9: memref<32x128xbf16, #tpu.memory_space<vmem>>, %arg10: memref<1x128xf32, #tpu.memory_space<vmem>>, %arg11: memref<1x16xf32, #tpu.memory_space<vmem>>, %arg12: memref<1x1xf32, #tpu.memory_space<vmem>>, %arg13: memref<16x5xbf16, #tpu.memory_space<vmem>>, %arg14: memref<1x5xf32, #tpu.memory_space<vmem>>, %arg15: memref<8x8x32xbf16, #tpu.memory_space<vmem>>, %arg16: memref<8x8x32xbf16, #tpu.memory_space<vmem>>, %arg17: memref<8x8x8xf32, #tpu.memory_space<vmem>>, %arg18: memref<8x5xf32, #tpu.memory_space<vmem>>, %arg19: memref<8x32xf32, #tpu.memory_space<vmem>>) attributes {dimension_semantics = [#tpu.dimension_semantics<parallel>], iteration_bounds = array<i64: 1>, scalar_prefetch = 0 : i64, scratch_operands = 0 : i64, tpu.core_type = #tpu.core_type<tc>, window_params = [{transform_indices = @transform_0, window_bounds = array<i64: 8, 32>}, {transform_indices = @transform_1, window_bounds = array<i64: 8, 8, 32>}, {pipeline_mode = #tpu.pipeline_mode<synchronous>, transform_indices = @transform_2, window_bounds = array<i64: 32, 128>}, {pipeline_mode = #tpu.pipeline_mode<synchronous>, transform_indices = @transform_3, window_bounds = array<i64: 1, 128>}, {pipeline_mode = #tpu.pipeline_mode<synchronous>, transform_indices = @transform_4, window_bounds = array<i64: 32, 128>}, {pipeline_mode = #tpu.pipeline_mode<synchronous>, transform_indices = @transform_5, window_bounds = array<i64: 1, 128>}, {pipeline_mode = #tpu.pipeline_mode<synchronous>, transform_indices = @transform_6, window_bounds = array<i64: 32, 32>}, {pipeline_mode = #tpu.pipeline_mode<synchronous>, transform_indices = @transform_7, window_bounds = array<i64: 1, 32>}, {pipeline_mode = #tpu.pipeline_mode<synchronous>, transform_indices = @transform_8, window_bounds = array<i64: 32, 128>}, {pipeline_mode = #tpu.pipeline_mode<synchronous>, transform_indices = @transform_9, window_bounds = array<i64: 1, 128>}, {pipeline_mode = #tpu.pipeline_mode<synchronous>, transform_indices = @transform_10, window_bounds = array<i64: 1, 16>}, {pipeline_mode = #tpu.pipeline_mode<synchronous>, transform_indices = @transform_11, window_bounds = array<i64: 1, 1>}, {pipeline_mode = #tpu.pipeline_mode<synchronous>, transform_indices = @transform_12, window_bounds = array<i64: 16, 5>}, {pipeline_mode = #tpu.pipeline_mode<synchronous>, transform_indices = @transform_13, window_bounds = array<i64: 1, 5>}, {transform_indices = @transform_14, window_bounds = array<i64: 8, 8, 32>}, {transform_indices = @transform_15, window_bounds = array<i64: 8, 8, 32>}, {transform_indices = @transform_16, window_bounds = array<i64: 8, 8, 8>}, {transform_indices = @transform_17, window_bounds = array<i64: 8, 5>}, {transform_indices = @transform_18, window_bounds = array<i64: 8, 32>}]} {
    %c0 = arith.constant 0 : index
    %c0_0 = arith.constant 0 : index
    %0 = vector.load %arg1[%c0, %c0_0] : memref<8x32xf32, #tpu.memory_space<vmem>>, vector<8x32xf32>
    %c0_1 = arith.constant 0 : index
    %c0_2 = arith.constant 0 : index
    %c0_3 = arith.constant 0 : index
    %1 = vector.load %arg2[%c0_1, %c0_2, %c0_3] : memref<8x8x32xf32, #tpu.memory_space<vmem>>, vector<8x8x32xf32>
    %2 = arith.truncf %0 : vector<8x32xf32> to vector<8x32xbf16>
    %c0_4 = arith.constant 0 : index
    %c0_5 = arith.constant 0 : index
    %3 = vector.load %arg3[%c0_4, %c0_5] : memref<32x128xbf16, #tpu.memory_space<vmem>>, vector<32x128xbf16>
    %cst = arith.constant dense<0.000000e+00> : vector<8x128xf32>
    %4 = tpu.matmul %2, %3, %cst {dimension_numbers = #tpu.dot_dimension_numbers<[1], [0], [0], [1], [0, 0, 1, 1], [], []>} : vector<8x32xbf16>, vector<32x128xbf16>, vector<8x128xf32> -> vector<8x128xf32>
    %c0_6 = arith.constant 0 : index
    %c0_7 = arith.constant 0 : index
    %5 = vector.load %arg4[%c0_6, %c0_7] : memref<1x128xf32, #tpu.memory_space<vmem>>, vector<1x128xf32>
    %6 = vector.broadcast %5 : vector<1x128xf32> to vector<8x128xf32>
    %7 = arith.addf %4, %6 : vector<8x128xf32>
    %8 = vector.extract_strided_slice %7 {offsets = [0, 0], sizes = [8, 32], strides = [1, 1]} : vector<8x128xf32> to vector<8x32xf32>
    %9 = vector.extract_strided_slice %7 {offsets = [0, 32], sizes = [8, 32], strides = [1, 1]} : vector<8x128xf32> to vector<8x32xf32>
    %10 = vector.extract_strided_slice %7 {offsets = [0, 64], sizes = [8, 16], strides = [1, 1]} : vector<8x128xf32> to vector<8x16xf32>
    %cst_8 = arith.constant 0.000000e+00 : f32
    %11 = vector.broadcast %cst_8 : f32 to vector<8x16xf32>
    %12 = arith.maximumf %10, %11 : vector<8x16xf32>
    %13 = vector.shape_cast %1 : vector<8x8x32xf32> to vector<64x32xf32>
    %14 = arith.truncf %13 : vector<64x32xf32> to vector<64x32xbf16>
    %c0_9 = arith.constant 0 : index
    %c0_10 = arith.constant 0 : index
    %15 = vector.load %arg5[%c0_9, %c0_10] : memref<32x128xbf16, #tpu.memory_space<vmem>>, vector<32x128xbf16>
    %cst_11 = arith.constant dense<0.000000e+00> : vector<64x128xf32>
    %16 = tpu.matmul %14, %15, %cst_11 {dimension_numbers = #tpu.dot_dimension_numbers<[1], [0], [0], [1], [0, 0, 1, 1], [], []>} : vector<64x32xbf16>, vector<32x128xbf16>, vector<64x128xf32> -> vector<64x128xf32>
    %c0_12 = arith.constant 0 : index
    %c0_13 = arith.constant 0 : index
    %17 = vector.load %arg6[%c0_12, %c0_13] : memref<1x128xf32, #tpu.memory_space<vmem>>, vector<1x128xf32>
    %18 = vector.broadcast %17 : vector<1x128xf32> to vector<64x128xf32>
    %19 = arith.addf %16, %18 : vector<64x128xf32>
    %20 = vector.shape_cast %19 : vector<64x128xf32> to vector<8x8x128xf32>
    %21 = vector.extract_strided_slice %20 {offsets = [0, 0, 0], sizes = [8, 8, 32], strides = [1, 1, 1]} : vector<8x8x128xf32> to vector<8x8x32xf32>
    %22 = vector.extract_strided_slice %20 {offsets = [0, 0, 32], sizes = [8, 8, 32], strides = [1, 1, 1]} : vector<8x8x128xf32> to vector<8x8x32xf32>
    %23 = vector.extract_strided_slice %20 {offsets = [0, 0, 64], sizes = [8, 8, 32], strides = [1, 1, 1]} : vector<8x8x128xf32> to vector<8x8x32xf32>
    %24 = vector.extract_strided_slice %20 {offsets = [0, 0, 96], sizes = [8, 8, 5], strides = [1, 1, 1]} : vector<8x8x128xf32> to vector<8x8x5xf32>
    %25 = arith.negf %24 : vector<8x8x5xf32>
    %26 = math.exp %25 : vector<8x8x5xf32>
    %cst_14 = arith.constant 1.000000e+00 : f32
    %27 = vector.broadcast %cst_14 : f32 to vector<8x8x5xf32>
    %28 = arith.addf %27, %26 : vector<8x8x5xf32>
    %29 = arith.divf %27, %28 : vector<8x8x5xf32>
    %30 = vector.extract_strided_slice %29 {offsets = [0, 0, 0], sizes = [8, 8, 1], strides = [1, 1, 1]} : vector<8x8x5xf32> to vector<8x8x1xf32>
    %31 = vector.extract_strided_slice %29 {offsets = [0, 0, 1], sizes = [8, 8, 1], strides = [1, 1, 1]} : vector<8x8x5xf32> to vector<8x8x1xf32>
    %32 = arith.mulf %30, %31 : vector<8x8x1xf32>
    %33 = vector.extract_strided_slice %29 {offsets = [0, 0, 2], sizes = [8, 8, 1], strides = [1, 1, 1]} : vector<8x8x5xf32> to vector<8x8x1xf32>
    %34 = arith.mulf %32, %33 : vector<8x8x1xf32>
    %35 = vector.extract_strided_slice %29 {offsets = [0, 0, 3], sizes = [8, 8, 1], strides = [1, 1, 1]} : vector<8x8x5xf32> to vector<8x8x1xf32>
    %36 = vector.extract_strided_slice %29 {offsets = [0, 0, 4], sizes = [8, 8, 1], strides = [1, 1, 1]} : vector<8x8x5xf32> to vector<8x8x1xf32>
    %37 = vector.shape_cast %8 : vector<8x32xf32> to vector<8x1x32xf32>
    %38 = vector.broadcast %34 : vector<8x8x1xf32> to vector<8x8x32xf32>
    %39 = arith.mulf %21, %38 : vector<8x8x32xf32>
    %40 = vector.broadcast %37 : vector<8x1x32xf32> to vector<8x8x32xf32>
    %41 = arith.mulf %40, %39 : vector<8x8x32xf32>
    %cst_15 = arith.constant dense<0.000000e+00> : vector<8x8xf32>
    %42 = vector.multi_reduction <add>, %41, %cst_15 [2] : vector<8x8x32xf32> to vector<8x8xf32>
    %43 = vector.shape_cast %42 : vector<8x8xf32> to vector<8x8x1xf32>
    %cst_16 = arith.constant dense<0xFF800000> : vector<8x1xf32>
    %44 = vector.multi_reduction <maximumf>, %43, %cst_16 [1] : vector<8x8x1xf32> to vector<8x1xf32>
    %45 = vector.shape_cast %44 : vector<8x1xf32> to vector<8x1x1xf32>
    %46 = vector.broadcast %45 : vector<8x1x1xf32> to vector<8x8x1xf32>
    %47 = arith.subf %43, %46 : vector<8x8x1xf32>
    %48 = math.exp %47 : vector<8x8x1xf32>
    %cst_17 = arith.constant dense<0.000000e+00> : vector<8x1xf32>
    %49 = vector.multi_reduction <add>, %48, %cst_17 [1] : vector<8x8x1xf32> to vector<8x1xf32>
    %50 = vector.shape_cast %49 : vector<8x1xf32> to vector<8x1x1xf32>
    %51 = tpu.reciprocal %50 {approx = true} : vector<8x1x1xf32> -> vector<8x1x1xf32>
    %52 = vector.broadcast %51 : vector<8x1x1xf32> to vector<8x8x1xf32>
    %53 = arith.mulf %48, %52 : vector<8x8x1xf32>
    %54 = vector.broadcast %53 : vector<8x8x1xf32> to vector<8x8x32xf32>
    %55 = arith.mulf %54, %22 : vector<8x8x32xf32>
    %cst_18 = arith.constant dense<0.000000e+00> : vector<8x32xf32>
    %56 = vector.multi_reduction <add>, %55, %cst_18 [1] : vector<8x8x32xf32> to vector<8x32xf32>
    %57 = vector.shape_cast %56 : vector<8x32xf32> to vector<8x1x32xf32>
    %58 = vector.shape_cast %9 : vector<8x32xf32> to vector<8x1x32xf32>
    %59 = vector.broadcast %58 : vector<8x1x32xf32> to vector<8x8x32xf32>
    %60 = arith.addf %23, %59 : vector<8x8x32xf32>
    %cst_19 = arith.constant 0.000000e+00 : f32
    %61 = vector.broadcast %cst_19 : f32 to vector<8x8x32xf32>
    %62 = arith.maximumf %60, %61 : vector<8x8x32xf32>
    %63 = vector.shape_cast %62 : vector<8x8x32xf32> to vector<64x32xf32>
    %64 = arith.truncf %63 : vector<64x32xf32> to vector<64x32xbf16>
    %c0_20 = arith.constant 0 : index
    %c0_21 = arith.constant 0 : index
    %65 = vector.load %arg7[%c0_20, %c0_21] : memref<32x32xbf16, #tpu.memory_space<vmem>>, vector<32x32xbf16>
    %cst_22 = arith.constant dense<0.000000e+00> : vector<64x32xf32>
    %66 = tpu.matmul %64, %65, %cst_22 {dimension_numbers = #tpu.dot_dimension_numbers<[1], [0], [0], [1], [0, 0, 1, 1], [], []>} : vector<64x32xbf16>, vector<32x32xbf16>, vector<64x32xf32> -> vector<64x32xf32>
    %c0_23 = arith.constant 0 : index
    %c0_24 = arith.constant 0 : index
    %67 = vector.load %arg8[%c0_23, %c0_24] : memref<1x32xf32, #tpu.memory_space<vmem>>, vector<1x32xf32>
    %68 = vector.broadcast %67 : vector<1x32xf32> to vector<64x32xf32>
    %69 = arith.addf %66, %68 : vector<64x32xf32>
    %70 = arith.negf %69 : vector<64x32xf32>
    %71 = math.exp %70 : vector<64x32xf32>
    %cst_25 = arith.constant 1.000000e+00 : f32
    %72 = vector.broadcast %cst_25 : f32 to vector<64x32xf32>
    %73 = arith.addf %72, %71 : vector<64x32xf32>
    %74 = arith.divf %72, %73 : vector<64x32xf32>
    %75 = vector.shape_cast %74 : vector<64x32xf32> to vector<8x8x32xf32>
    %76 = vector.shape_cast %0 : vector<8x32xf32> to vector<8x1x32xf32>
    %77 = vector.broadcast %35 : vector<8x8x1xf32> to vector<8x8x32xf32>
    %78 = vector.broadcast %76 : vector<8x1x32xf32> to vector<8x8x32xf32>
    %79 = arith.mulf %77, %78 : vector<8x8x32xf32>
    %80 = vector.broadcast %36 : vector<8x8x1xf32> to vector<8x8x32xf32>
    %81 = arith.mulf %80, %1 : vector<8x8x32xf32>
    %82 = arith.subf %79, %81 : vector<8x8x32xf32>
    %83 = vector.broadcast %36 : vector<8x8x1xf32> to vector<8x8x32xf32>
    %84 = vector.broadcast %57 : vector<8x1x32xf32> to vector<8x8x32xf32>
    %85 = arith.mulf %83, %84 : vector<8x8x32xf32>
    %86 = arith.addf %82, %85 : vector<8x8x32xf32>
    %87 = arith.mulf %86, %75 : vector<8x8x32xf32>
    %88 = vector.shape_cast %87 : vector<8x8x32xf32> to vector<64x32xf32>
    %89 = arith.truncf %88 : vector<64x32xf32> to vector<64x32xbf16>
    %c0_26 = arith.constant 0 : index
    %c0_27 = arith.constant 0 : index
    %90 = vector.load %arg9[%c0_26, %c0_27] : memref<32x128xbf16, #tpu.memory_space<vmem>>, vector<32x128xbf16>
    %cst_28 = arith.constant dense<0.000000e+00> : vector<64x128xf32>
    %91 = tpu.matmul %89, %90, %cst_28 {dimension_numbers = #tpu.dot_dimension_numbers<[1], [0], [0], [1], [0, 0, 1, 1], [], []>} : vector<64x32xbf16>, vector<32x128xbf16>, vector<64x128xf32> -> vector<64x128xf32>
    %c0_29 = arith.constant 0 : index
    %c0_30 = arith.constant 0 : index
    %92 = vector.load %arg10[%c0_29, %c0_30] : memref<1x128xf32, #tpu.memory_space<vmem>>, vector<1x128xf32>
    %93 = vector.broadcast %92 : vector<1x128xf32> to vector<64x128xf32>
    %94 = arith.addf %91, %93 : vector<64x128xf32>
    %95 = vector.shape_cast %94 : vector<64x128xf32> to vector<8x8x128xf32>
    %96 = vector.extract_strided_slice %95 {offsets = [0, 0, 0], sizes = [8, 8, 16], strides = [1, 1, 1]} : vector<8x8x128xf32> to vector<8x8x16xf32>
    %cst_31 = arith.constant 0.000000e+00 : f32
    %97 = vector.broadcast %cst_31 : f32 to vector<8x8x16xf32>
    %98 = arith.maximumf %96, %97 : vector<8x8x16xf32>
    %99 = vector.extract_strided_slice %95 {offsets = [0, 0, 16], sizes = [8, 8, 3], strides = [1, 1, 1]} : vector<8x8x128xf32> to vector<8x8x3xf32>
    %100 = arith.negf %99 : vector<8x8x3xf32>
    %101 = math.exp %100 : vector<8x8x3xf32>
    %cst_32 = arith.constant 1.000000e+00 : f32
    %102 = vector.broadcast %cst_32 : f32 to vector<8x8x3xf32>
    %103 = arith.addf %102, %101 : vector<8x8x3xf32>
    %104 = arith.divf %102, %103 : vector<8x8x3xf32>
    %c0_33 = arith.constant 0 : index
    %c0_34 = arith.constant 0 : index
    %105 = vector.load %arg11[%c0_33, %c0_34] : memref<1x16xf32, #tpu.memory_space<vmem>>, vector<1x16xf32>
    %106 = vector.shape_cast %105 : vector<1x16xf32> to vector<1x1x16xf32>
    %107 = vector.broadcast %106 : vector<1x1x16xf32> to vector<8x8x16xf32>
    %108 = arith.mulf %98, %107 : vector<8x8x16xf32>
    %cst_35 = arith.constant dense<0.000000e+00> : vector<8x8xf32>
    %109 = vector.multi_reduction <add>, %108, %cst_35 [2] : vector<8x8x16xf32> to vector<8x8xf32>
    %110 = vector.shape_cast %109 : vector<8x8xf32> to vector<8x8x1xf32>
    %c0_36 = arith.constant 0 : index
    %c0_37 = arith.constant 0 : index
    %111 = vector.load %arg12[%c0_36, %c0_37] : memref<1x1xf32, #tpu.memory_space<vmem>>, vector<1x1xf32>
    %112 = vector.shape_cast %111 : vector<1x1xf32> to vector<1x1x1xf32>
    %113 = vector.broadcast %112 : vector<1x1x1xf32> to vector<8x8x1xf32>
    %114 = arith.addf %110, %113 : vector<8x8x1xf32>
    %115 = arith.negf %114 : vector<8x8x1xf32>
    %116 = math.exp %115 : vector<8x8x1xf32>
    %cst_38 = arith.constant 1.000000e+00 : f32
    %117 = vector.broadcast %cst_38 : f32 to vector<8x8x1xf32>
    %118 = arith.addf %117, %116 : vector<8x8x1xf32>
    %119 = arith.divf %117, %118 : vector<8x8x1xf32>
    %120 = arith.truncf %12 : vector<8x16xf32> to vector<8x16xbf16>
    %c0_39 = arith.constant 0 : index
    %c0_40 = arith.constant 0 : index
    %121 = vector.load %arg13[%c0_39, %c0_40] : memref<16x5xbf16, #tpu.memory_space<vmem>>, vector<16x5xbf16>
    %cst_41 = arith.constant dense<0.000000e+00> : vector<8x5xf32>
    %122 = tpu.matmul %120, %121, %cst_41 {dimension_numbers = #tpu.dot_dimension_numbers<[1], [0], [0], [1], [0, 0, 1, 1], [], []>} : vector<8x16xbf16>, vector<16x5xbf16>, vector<8x5xf32> -> vector<8x5xf32>
    %c0_42 = arith.constant 0 : index
    %c0_43 = arith.constant 0 : index
    %123 = vector.load %arg14[%c0_42, %c0_43] : memref<1x5xf32, #tpu.memory_space<vmem>>, vector<1x5xf32>
    %124 = vector.broadcast %123 : vector<1x5xf32> to vector<8x5xf32>
    %125 = arith.addf %122, %124 : vector<8x5xf32>
    %cst_44 = arith.constant dense<0xFF800000> : vector<8xf32>
    %126 = vector.multi_reduction <maximumf>, %125, %cst_44 [1] : vector<8x5xf32> to vector<8xf32>
    %127 = vector.shape_cast %126 : vector<8xf32> to vector<8x1xf32>
    %128 = vector.broadcast %127 : vector<8x1xf32> to vector<8x5xf32>
    %129 = arith.subf %125, %128 : vector<8x5xf32>
    %130 = math.exp %129 : vector<8x5xf32>
    %cst_45 = arith.constant dense<0.000000e+00> : vector<8xf32>
    %131 = vector.multi_reduction <add>, %130, %cst_45 [1] : vector<8x5xf32> to vector<8xf32>
    %132 = vector.shape_cast %131 : vector<8xf32> to vector<8x1xf32>
    %133 = tpu.reciprocal %132 {approx = true} : vector<8x1xf32> -> vector<8x1xf32>
    %134 = vector.broadcast %133 : vector<8x1xf32> to vector<8x5xf32>
    %135 = arith.mulf %130, %134 : vector<8x5xf32>
    %c0_46 = arith.constant 0 : index
    %c0_47 = arith.constant 0 : index
    %136 = vector.load %arg18[%c0_46, %c0_47] : memref<8x5xf32, #tpu.memory_space<vmem>>, vector<8x5xf32>
    tpu.vector_store %arg18[%c0_46, %c0_47], %135 {strides = array<i32>} : memref<8x5xf32, #tpu.memory_space<vmem>>, vector<8x5xf32>,
    %137 = tpu.iota {dimensions = array<i32: 1>} : vector<8x8x1xi32>
    %cst_48 = arith.constant dense<0xFF800000> : vector<8x1xf32>
    %138 = vector.multi_reduction <maximumf>, %119, %cst_48 [1] : vector<8x8x1xf32> to vector<8x1xf32>
    %139 = vector.shape_cast %138 : vector<8x1xf32> to vector<8x1x1xf32>
    %140 = vector.broadcast %139 : vector<8x1x1xf32> to vector<8x8x1xf32>
    %141 = arith.cmpf oeq, %119, %140 : vector<8x8x1xf32>
    %c8_i32 = arith.constant 8 : i32
    %142 = vector.broadcast %c8_i32 : i32 to vector<8x8x1xi32>
    %143 = arith.select %141, %137, %142 : vector<8x8x1xi1>, vector<8x8x1xi32>
    %cst_49 = arith.constant dense<2147483647> : vector<8x1xi32>
    %144 = vector.multi_reduction <minsi>, %143, %cst_49 [1] : vector<8x8x1xi32> to vector<8x1xi32>
    %145 = vector.shape_cast %144 : vector<8x1xi32> to vector<8x1x1xi32>
    %146 = vector.broadcast %145 : vector<8x1x1xi32> to vector<8x8x1xi32>
    %147 = arith.cmpi eq, %137, %146 : vector<8x8x1xi32>
    %cst_50 = arith.constant 0.000000e+00 : f32
    %148 = vector.shape_cast %147 : vector<8x8x1xi1> to vector<8x8x1xi1>
    %149 = vector.broadcast %148 : vector<8x8x1xi1> to vector<8x8x32xi1>
    %150 = vector.broadcast %cst_50 : f32 to vector<8x8x32xf32>
    %151 = arith.select %149, %87, %150 : vector<8x8x32xi1>, vector<8x8x32xf32>
    %cst_51 = arith.constant dense<0.000000e+00> : vector<8x32xf32>
    %152 = vector.multi_reduction <add>, %151, %cst_51 [1] : vector<8x8x32xf32> to vector<8x32xf32>
    %c0_52 = arith.constant 0 : index
    %c0_53 = arith.constant 0 : index
    %153 = vector.load %arg19[%c0_52, %c0_53] : memref<8x32xf32, #tpu.memory_space<vmem>>, vector<8x32xf32>
    tpu.vector_store %arg19[%c0_52, %c0_53], %152 {strides = array<i32>} : memref<8x32xf32, #tpu.memory_space<vmem>>, vector<8x32xf32>,
    %154 = arith.truncf %87 : vector<8x8x32xf32> to vector<8x8x32xbf16>
    %c0_54 = arith.constant 0 : index
    %c0_55 = arith.constant 0 : index
    %c0_56 = arith.constant 0 : index
    %155 = vector.load %arg15[%c0_54, %c0_55, %c0_56] : memref<8x8x32xbf16, #tpu.memory_space<vmem>>, vector<8x8x32xbf16>
    tpu.vector_store %arg15[%c0_54, %c0_55, %c0_56], %154 {strides = array<i32>} : memref<8x8x32xbf16, #tpu.memory_space<vmem>>, vector<8x8x32xbf16>,
    %156 = arith.truncf %75 : vector<8x8x32xf32> to vector<8x8x32xbf16>
    %c0_57 = arith.constant 0 : index
    %c0_58 = arith.constant 0 : index
    %c0_59 = arith.constant 0 : index
    %157 = vector.load %arg16[%c0_57, %c0_58, %c0_59] : memref<8x8x32xbf16, #tpu.memory_space<vmem>>, vector<8x8x32xbf16>
    tpu.vector_store %arg16[%c0_57, %c0_58, %c0_59], %156 {strides = array<i32>} : memref<8x8x32xbf16, #tpu.memory_space<vmem>>, vector<8x8x32xbf16>,
    %cst_60 = arith.constant 0.000000e+00 : f32
    %158 = vector.broadcast %cst_60 : f32 to vector<8x8x2xf32>
    %159 = tpu.concatenate %35, %36, %104, %119, %158 in 2 : vector<8x8x1xf32>, vector<8x8x1xf32>, vector<8x8x3xf32>, vector<8x8x1xf32>, vector<8x8x2xf32> -> vector<8x8x8xf32>
    %c0_61 = arith.constant 0 : index
    %c0_62 = arith.constant 0 : index
    %c0_63 = arith.constant 0 : index
    %160 = vector.load %arg17[%c0_61, %c0_62, %c0_63] : memref<8x8x8xf32, #tpu.memory_space<vmem>>, vector<8x8x8xf32>
    tpu.vector_store %arg17[%c0_61, %c0_62, %c0_63], %159 {strides = array<i32>} : memref<8x8x8xf32, #tpu.memory_space<vmem>>, vector<8x8x8xf32>,
    return
  }
  func.func @transform_0(%arg0: i32) -> (i32, i32) {
    %c0_i32 = arith.constant 0 : i32
    %c0_i32_0 = arith.constant 0 : i32
    return %arg0, %c0_i32 : i32, i32
  }
  func.func @transform_1(%arg0: i32) -> (i32, i32, i32) {
    %c0_i32 = arith.constant 0 : i32
    %c0_i32_0 = arith.constant 0 : i32
    %c0_i32_1 = arith.constant 0 : i32
    return %arg0, %c0_i32, %c0_i32_0 : i32, i32, i32
  }
  func.func @transform_2(%arg0: i32) -> (i32, i32) {
    %c0_i32 = arith.constant 0 : i32
    %c0_i32_0 = arith.constant 0 : i32
    %c0_i32_1 = arith.constant 0 : i32
    return %c0_i32, %c0_i32_0 : i32, i32
  }
  func.func @transform_3(%arg0: i32) -> (i32, i32) {
    %c0_i32 = arith.constant 0 : i32
    %c0_i32_0 = arith.constant 0 : i32
    %c0_i32_1 = arith.constant 0 : i32
    return %c0_i32, %c0_i32_0 : i32, i32
  }
  func.func @transform_4(%arg0: i32) -> (i32, i32) {
    %c0_i32 = arith.constant 0 : i32
    %c0_i32_0 = arith.constant 0 : i32
    %c0_i32_1 = arith.constant 0 : i32
    return %c0_i32, %c0_i32_0 : i32, i32
  }
  func.func @transform_5(%arg0: i32) -> (i32, i32) {
    %c0_i32 = arith.constant 0 : i32
    %c0_i32_0 = arith.constant 0 : i32
    %c0_i32_1 = arith.constant 0 : i32
    return %c0_i32, %c0_i32_0 : i32, i32
  }
  func.func @transform_6(%arg0: i32) -> (i32, i32) {
    %c0_i32 = arith.constant 0 : i32
    %c0_i32_0 = arith.constant 0 : i32
    %c0_i32_1 = arith.constant 0 : i32
    return %c0_i32, %c0_i32_0 : i32, i32
  }
  func.func @transform_7(%arg0: i32) -> (i32, i32) {
    %c0_i32 = arith.constant 0 : i32
    %c0_i32_0 = arith.constant 0 : i32
    %c0_i32_1 = arith.constant 0 : i32
    return %c0_i32, %c0_i32_0 : i32, i32
  }
  func.func @transform_8(%arg0: i32) -> (i32, i32) {
    %c0_i32 = arith.constant 0 : i32
    %c0_i32_0 = arith.constant 0 : i32
    %c0_i32_1 = arith.constant 0 : i32
    return %c0_i32, %c0_i32_0 : i32, i32
  }
  func.func @transform_9(%arg0: i32) -> (i32, i32) {
    %c0_i32 = arith.constant 0 : i32
    %c0_i32_0 = arith.constant 0 : i32
    %c0_i32_1 = arith.constant 0 : i32
    return %c0_i32, %c0_i32_0 : i32, i32
  }
  func.func @transform_10(%arg0: i32) -> (i32, i32) {
    %c0_i32 = arith.constant 0 : i32
    %c0_i32_0 = arith.constant 0 : i32
    %c0_i32_1 = arith.constant 0 : i32
    return %c0_i32, %c0_i32_0 : i32, i32
  }
  func.func @transform_11(%arg0: i32) -> (i32, i32) {
    %c0_i32 = arith.constant 0 : i32
    %c0_i32_0 = arith.constant 0 : i32
    %c0_i32_1 = arith.constant 0 : i32
    return %c0_i32, %c0_i32_0 : i32, i32
  }
  func.func @transform_12(%arg0: i32) -> (i32, i32) {
    %c0_i32 = arith.constant 0 : i32
    %c0_i32_0 = arith.constant 0 : i32
    %c0_i32_1 = arith.constant 0 : i32
    return %c0_i32, %c0_i32_0 : i32, i32
  }
  func.func @transform_13(%arg0: i32) -> (i32, i32) {
    %c0_i32 = arith.constant 0 : i32
    %c0_i32_0 = arith.constant 0 : i32
    %c0_i32_1 = arith.constant 0 : i32
    return %c0_i32, %c0_i32_0 : i32, i32
  }
  func.func @transform_14(%arg0: i32) -> (i32, i32, i32) {
    %c0_i32 = arith.constant 0 : i32
    %c0_i32_0 = arith.constant 0 : i32
    %c0_i32_1 = arith.constant 0 : i32
    return %arg0, %c0_i32, %c0_i32_0 : i32, i32, i32
  }
  func.func @transform_15(%arg0: i32) -> (i32, i32, i32) {
    %c0_i32 = arith.constant 0 : i32
    %c0_i32_0 = arith.constant 0 : i32
    %c0_i32_1 = arith.constant 0 : i32
    return %arg0, %c0_i32, %c0_i32_0 : i32, i32, i32
  }
  func.func @transform_16(%arg0: i32) -> (i32, i32, i32) {
    %c0_i32 = arith.constant 0 : i32
    %c0_i32_0 = arith.constant 0 : i32
    %c0_i32_1 = arith.constant 0 : i32
    return %arg0, %c0_i32, %c0_i32_0 : i32, i32, i32
  }
  func.func @transform_17(%arg0: i32) -> (i32, i32) {
    %c0_i32 = arith.constant 0 : i32
    %c0_i32_0 = arith.constant 0 : i32
    return %arg0, %c0_i32 : i32, i32
  }
  func.func @transform_18(%arg0: i32) -> (i32, i32) {
    %c0_i32 = arith.constant 0 : i32
    %c0_i32_0 = arith.constant 0 : i32
    return %arg0, %c0_i32 : i32, i32
  }
}

</mosaic_0001>

<bundles_post_ra>
// kernel: tpu_custom_call.1
= control target key start
LH: loop header
LB: loop body
LE: loop exit
PB: predicated region body
PF: predicated region fallthrough
CT: control target
= control target key end

     0   :  { %s3552_s0 = inlined_call_operand.hbm [shape: f32[8,32], index: 0, kind: input, shape index: {}]   ;;  %s3553_s1 = inlined_call_operand.hbm [shape: f32[8,8,32], index: 1, kind: input, shape index: {}]   ;;  %s3554_s2 = inlined_call_operand.vmem [shape: bf16[32,128], index: 2, kind: input, shape index: {}]   ;;  %s3555_s3 = inlined_call_operand.vmem [shape: f32[1,128], index: 3, kind: input, shape index: {}]   ;;  %s3556_s4 = inlined_call_operand.hbm [shape: bf16[32,128], index: 4, kind: input, shape index: {}]   ;;  %s3557_s5 = inlined_call_operand.vmem [shape: f32[1,128], index: 5, kind: input, shape index: {}]   ;;  %s3558_s6 = inlined_call_operand.hbm [shape: bf16[32,32], index: 6, kind: input, shape index: {}]   ;;  %s3559_s7 = inlined_call_operand.vmem [shape: f32[1,32], index: 7, kind: input, shape index: {}]   ;;  %s3560_s8 = inlined_call_operand.hbm [shape: bf16[32,128], index: 8, kind: input, shape index: {}]   ;;  %s3561_s9 = inlined_call_operand.vmem [shape: f32[1,128], index: 9, kind: input, shape index: {}]   ;;  %s3562_s10 = inlined_call_operand.vmem [shape: f32[1,16], index: 10, kind: input, shape index: {}]   ;;  %s3563_s11 = inlined_call_operand.<no memory space> [shape: f32[1,1], index: 11, kind: input, shape index: {}]   ;;  %s3564_s12 = inlined_call_operand.vmem [shape: bf16[16,5], index: 12, kind: input, shape index: {}]   ;;  %s3565_s13 = inlined_call_operand.vmem [shape: f32[1,5], index: 13, kind: input, shape index: {}]   ;;  %s3566_s14 = inlined_call_operand.hbm [shape: bf16[8,8,32], index: 14, kind: output, shape index: {0}]   ;;  %s3567_s15 = inlined_call_operand.hbm [shape: bf16[8,8,32], index: 15, kind: output, shape index: {1}]   ;;  %s3568_s16 = inlined_call_operand.hbm [shape: f32[8,8,8], index: 16, kind: output, shape index: {2}]   ;;  %s3569_s17 = inlined_call_operand.hbm [shape: f32[8,5], index: 17, kind: output, shape index: {3}]   ;;  %s3570_s18 = inlined_call_operand.hbm [shape: f32[8,32], index: 18, kind: output, shape index: {4}]  }
   0x1   :  { %3573 = sst [smem:[#allocation25_spill]] %s3552_s0  ;;  %v24_v0 = vstv %s3563_s11 }
   0x2   :  { %3574 = sst [smem:[#allocation26_spill]] %s3553_s1  ;;  %25 = vst [vmem:[#allocation2] sm:$0x1] %v24_v0 }
   0x3   :  { %3575 = sst [smem:[#allocation27_spill]] %s3554_s2 }
   0x4   :  { %26 = vsyncpa [#allocation4], 0 }
   0x5   :  { %27 = vsyncpa [#allocation7], 0 }
   0x6   :  { %28 = vsyncpa [#allocation10], 0 }
   0x7   :  { %29 = vsyncpa [#allocation5], 0 }
   0x8   :  { %30 = vsyncpa [#allocation14], 0 }
   0x9   :  { %31 = vsyncpa [#allocation17], 0  ;;  %s2662_s29 = smov [#allocation6]  }
   0xa   :  { %s47_s30 = sshll.u32 %s2662_s29, 4  ;;  %s48_s30 = int_to_ptr.vmem [resolvable:$true] %s47_s30 }
   0xb   :  { %s2458_s0 = scalar_lea.vmem %s48_s30, 1024  ;;  %p2463_p1 = scmp.lt.s32.totalorder %s48_s30, %s48_s30 }
   0xc   :  { %p2459_p0 = scmp.ne.s32.totalorder %s48_s30, %s2458_s0  ;;  %p2464_p2 = scmp.lt.s32.totalorder %s2458_s0, %s2458_s0 }
   0xe   :  { %p2465_p3 = por %p2464_p2, %p2463_p1 }
  0x10   :  { %p2466_p4 = pnand %p2465_p3, %p2459_p0 }
  0x12   :  { %2469 = shalt.err (!%p2466_p4)
}
  0x13   :  { %s3572_s19 = smov 128   ;;  %s2664_s1 = smov 8  }
  0x14   :  { %s3576_s21 = sld [smem:[#allocation26_spill]]  ;;  %s2665_s22 = smov [#allocation9]  }
  0x15   :  { %s77_s2 = sshll.u32 %s2665_s22, 4  ;;  %s2666_s23 = smov [#allocation3]   ;;  %s78_s2 = int_to_ptr.vmem [resolvable:$true] %s77_s2 }
  0x16   :  { %s38_s24 = sshll.u32 %s2666_s23, 4  ;;  %s2478_s25 = scalar_lea.vmem %s78_s2, 256  ;;  %s39_s24 = int_to_ptr.vmem [resolvable:$true] %s38_s24 }
  0x17   :  { %p2479_p5 = scmp.ne.s32.totalorder %s78_s2, %s2478_s25  ;;  %p2483_p6 = scmp.lt.s32.totalorder %s78_s2, %s78_s2 }
  0x18   :  { %p2484_p7 = scmp.lt.s32.totalorder %s2478_s25, %s2478_s25 }
  0x1a   :  { %53 = dma.hbm_to_vmem [thread:$0]  %s3576_s21, 1024, %s48_s30, [#allocation7], %s3572_s19, %s3572_s19, %s2664_s1  }
  0x1b   :  { %p2485_p8 = por %p2484_p7, %p2483_p6 }
  0x1d   :  { %p2486_p9 = pnand %p2485_p8, %p2479_p5 }
  0x1f   :  { %2489 = shalt.err (!%p2486_p9)
}
  0x20   :  { %s2667_s26 = smov 64   ;;  %s2668_s27 = smov 4  }
  0x21   :  { %83 = dma.hbm_to_vmem [thread:$0]  %s3558_s6, 256, %s78_s2, [#allocation10], %s2667_s26, %s2667_s26, %s2668_s27  }
  0x22   :  { %s2498_s30 = scalar_lea.vmem %s39_s24, 128  ;;  %p2503_p11 = scmp.lt.s32.totalorder %s39_s24, %s39_s24 }
  0x23   :  { %p2499_p10 = scmp.ne.s32.totalorder %s39_s24, %s2498_s30  ;;  %p2504_p12 = scmp.lt.s32.totalorder %s2498_s30, %s2498_s30 }
  0x25   :  { %p2505_p13 = por %p2504_p12, %p2503_p11 }
  0x27   :  { %p2506_p0 = pnand %p2505_p13, %p2499_p10 }
  0x29   :  { %2509 = shalt.err (!%p2506_p0)
}
  0x2a   :  { %s3577_s20 = sld [smem:[#allocation25_spill]]  ;;  %s2669_s21 = smov [#allocation8]  }
  0x2b   :  { %s63_s22 = sshll.u32 %s2669_s21, 4  ;;  %s2670_s23 = smov [#allocation11]   ;;  %s64_s22 = int_to_ptr.vmem [resolvable:$true] %s63_s22 }
  0x2c   :  { %s91_s25 = sshll.u32 %s2670_s23, 4  ;;  %s2518_s19 = scalar_lea.vmem %s64_s22, 256  ;;  %s92_s25 = int_to_ptr.vmem [resolvable:$true] %s91_s25 }
  0x2d   :  { %p2519_p1 = scmp.ne.s32.totalorder %s64_s22, %s2518_s19  ;;  %p2523_p2 = scmp.lt.s32.totalorder %s64_s22, %s64_s22 }
  0x2e   :  { %p2524_p3 = scmp.lt.s32.totalorder %s2518_s19, %s2518_s19 }
  0x30   :  { %41 = dma.hbm_to_vmem [thread:$0]  %s3577_s20, 128, %s39_s24, [#allocation4]  }
  0x31   :  { %p2525_p4 = por %p2524_p3, %p2523_p2 }
  0x33   :  { %p2526_p5 = pnand %p2525_p4, %p2519_p1 }
  0x35   :  { %2529 = shalt.err (!%p2526_p5)
}
  0x36   :  { %69 = dma.hbm_to_vmem [thread:$0]  %s3556_s4, 256, %s64_s22, [#allocation7], %s2667_s26, %s2667_s26, %s2668_s27  }
  0x37   :  { %s2538_s24 = scalar_lea.vmem %s92_s25, 256  ;;  %p2543_p7 = scmp.lt.s32.totalorder %s92_s25, %s92_s25 }
  0x38   :  { %p2539_p6 = scmp.ne.s32.totalorder %s92_s25, %s2538_s24  ;;  %p2544_p8 = scmp.lt.s32.totalorder %s2538_s24, %s2538_s24 }
  0x3a   :  { %p2545_p9 = por %p2544_p8, %p2543_p7 }
  0x3c   :  { %p2546_p10 = pnand %p2545_p9, %p2539_p6 }
  0x3e   :  { %2549 = shalt.err (!%p2546_p10)
}
  0x3f   :  { %97 = dma.hbm_to_vmem [thread:$0]  %s3560_s8, 256, %s92_s25, [#allocation10], %s2667_s26, %s2667_s26, %s2668_s27  }
  0x40   :  { %2650 = dma.done.wait [#allocation4], 128  }
  0x41   :  { %2651 = vsyncadd [#allocation4], 4294967168 }
  0x42   :  { %2652 = dma.done.wait [#allocation7], 1280  }
  0x43   :  { %2653 = vsyncadd [#allocation7], 4294966016 }
  0x44   :  { %2654 = dma.done.wait [#allocation10], 512  }
  0x45   :  { %2655 = vsyncadd [#allocation10], 4294966784  ;;  %v2671_v1 = vmov 0.0   ;;  %vm2672_vm0 = vmmov 0   ;;  %s3578_s30 = sld [smem:[#allocation27_spill]]  ;;  %v2269_v3 = vld [vmem:[#allocation8 + $0x8] sm:$0xff]   ;;  %v431_v22 = vlaneseq }
  0x46   :  { %2182 = vmatprep.subr.bf16.mxu0 %v2671_v1  ;;  %2186 = vmatprep.mubr.msk.bf16.mxu0 %vm2672_vm0, %v2671_v1  ;;  %v2271_v5 = vld [vmem:[#allocation8] sm:$0xff]   ;;  %v124_v6 = vld [vmem:[#allocation3] sm:$0xff]  ;;  %vm157_vm1 = vcmask 261120   ;;  %v126_v8 = vld [vmem:[#allocation6 + $0x8] sm:$0xff]  ;;  %v2673_v20 = vmov 1966171168  }
  0x47   :  { %2190 = vmatprep.subr.bf16.mxu1 %v2269_v3  ;;  %v125_v7 = vld [vmem:[#allocation6] sm:$0xff]  ;;  %v133_v9 = vpack.c.bf16 %v124_v6, %v124_v6  ;;  %v127_v11 = vld [vmem:[#allocation6 + $0x10] sm:$0xff]  ;;  %v128_v12 = vld [vmem:[#allocation6 + $0x18] sm:$0xff]  ;;  %v429_v21 = vunpack.c.l.s4 %v2673_v20  ;;  %v2830_v24 = vshrl.u32 %v431_v22, 7  ;;  %s2677_s23 = smov 126   ;;  %vm1872_vm2 = vcmask 257024  }
  0x48   :  { %2191 = vmatpush3.bf16.msra.mxu1 %v2269_v3  ;;  %v202_v10 = vpack.c.bf16 %v126_v8, %v125_v7  ;;  %v129_v13 = vld [vmem:[#allocation6 + $0x20] sm:$0xff]  ;;  %v130_v14 = vld [vmem:[#allocation6 + $0x28] sm:$0xff]  ;;  %v203_v15 = vpack.c.bf16 %v128_v12, %v127_v11  ;;  %v131_v17 = vld [vmem:[#allocation6 + $0x30] sm:$0xff]  ;;  %vm740_vm3 = vcmask 523520   ;;  %vm1410_vm4 = vcmask 130048   ;;  %s2682_s29 = smov 114  }
  0x49   :  { %2192 = vmatprep.subr.bf16.mxu1 %v2271_v5  ;;  %v204_v16 = vpack.c.bf16 %v130_v14, %v129_v13  ;;  %v132_v18 = vld [vmem:[#allocation6 + $0x38] sm:$0xff]  ;;  %v430_v23 = vunpack.c.0.s8 %v429_v21  ;;  %v2097_v25 = vld [vmem:[%s3555_s3] ss:$0 sm:$0xff]  ;;  %v2850_v36 = vsub.s32 0, %v2830_v24  ;;  %s2674_s3 = smov 32   ;;  %vm1560_vm5 = vcmask 39936  }
  0x4a   :  { %2194 = vmatprep.mubr.msk.bf16.mxu1 %vm157_vm1, %v202_v10  ;;  %v205_v19 = vpack.c.bf16 %v132_v18, %v131_v17  ;;  %v2101_v28 = vld [vmem:[%s3557_s5] ss:$0 sm:$0xff]  ;;  %s2675_s5 = smov 127   ;;  %vm1575_vm6 = vcmask 7168   ;;  %s2685_s8 = smov [#allocation13]  }
  0x4b   :  { %v2268_v2 = vld [vmem:[%s3578_s30 + $0x8] sm:$0xff]   ;;  %v2270_v4 = vld [vmem:[%s3578_s30] sm:$0xff]   ;;  %v2836_v26 = vsub.s32 %v430_v23, %v2830_v24  ;;  %s2684_s30 = smov 5   ;;  %s2037_s0 = sshll.u32 %s2685_s8, 4  ;;  %s2038_s0 = int_to_ptr.vmem [resolvable:$true] %s2037_s0 }
  0x4c   :  { %2183 = vmatpush3.bf16.msra.mxu0 %v2268_v2  ;;  %2193 = vmatpush3.bf16.msra.mxu1 %v2271_v5  ;;  %s2550_s11 = scalar_lea.vmem %s2038_s0, 512  ;;  %p2555_p12 = scmp.lt.s32.totalorder %s2038_s0, %s2038_s0 }
  0x4d   :  { %2184 = vmatprep.subr.bf16.mxu0 %v2671_v1  ;;  %p2551_p11 = scmp.ne.s32.totalorder %s2038_s0, %s2550_s11  ;;  %p2556_p13 = scmp.lt.s32.totalorder %s2550_s11, %s2550_s11 }
  0x4f   :  { %2195 = vmatmul.mubr.msk.bf16.vlgmr.msra.gmra.mxu1 %vm157_vm1, %v203_v15  ;;  %p2557_p0 = por %p2556_p13, %p2555_p12 }
  0x50   :  { %2185 = vmatpush3.bf16.msra.mxu0 %v2270_v4  ;;  %2198 = vmatprep.mubr.msk.bf16.mxu1 %vm157_vm1, %v204_v16 }
  0x51   :  { %p2558_p1 = pnand %p2557_p0, %p2551_p11 }
  0x53   :  { %2187 = vmatmul.mubr.msk.bf16.vlgmr.msra.gmra.mxu0 %vm157_vm1, %v133_v9 }
  0x57   :  { %2199 = vmatmul.mubr.msk.bf16.gmra.mxu1 %vm157_vm1, %v205_v19 }
 0x10f   :  { %v2196_v30 = vpop.f32.mrf.mxu1 }
 0x110   :  { %v2847_v34 = vadd.f32 %v2196_v30, %v2101_v28 }
 0x111   :  { %v275_v35 = vpop.f32.mrf.mxu1 }
 0x112   :  { %v2110_v40 = vmul.f32 -1.442695, %v2847_v34  ;;  %v2854_v41 = vadd.f32 %v2101_v28, %v275_v35 }
 0x113   :  { %v195_v27 = vpop.f32.mrf.mxu0  ;;  %v2197_v42 = vpop.f32.mrf.mxu1 }
 0x114   :  { %v2841_v29 = vadd.f32 %v2097_v25, %v195_v27  ;;  %2277 = vpow2.f32 %v2110_v40  ;;  %v2108_v45 = vmul.f32 -1.442695, %v2854_v41  ;;  %v2858_v46 = vadd.f32 %v2197_v42, %v2101_v28 }
 0x115   :  { %v2188_v31 = vpop.f32.mrf.mxu0  ;;  %v278_v48 = vpop.f32.mrf.mxu1 }
 0x116   :  { %v427_v32 = vcombine.high %v2841_v29, %v2841_v29  ;;  %v434_v33 = vrot.slane %v2841_v29, %v2836_v26  ;;  %v2111_v52 = vmul.f32 -1.442695, %v2858_v46  ;;  %v2865_v53 = vadd.f32 %v2101_v28, %v278_v48  ;;  %v2273_v48 = vld [vmem:[#allocation9] sm:$0xff]  }
 0x117   :  { %v198_v37 = vpop.f32.mrf.mxu0  ;;  %2279 = vpow2.f32 %v2108_v45  ;;  %v2200_v55 = vpop.f32.mrf.mxu1 }
 0x118   :  { %v441_v38 = vrot.slane %v427_v32, %v2836_v26  ;;  %v442_v39 = vcombine.high %v434_v33, %v434_v33  ;;  %v450_v43 = vrot.slane %v434_v33, %v2836_v26  ;;  %2281 = vpow2.f32 %v2111_v52 }
 0x119   :  { %v2189_v44 = vpop.f32.mrf.mxu0  ;;  %v2109_v59 = vmul.f32 -1.442695, %v2865_v53  ;;  %v2877_v60 = vadd.f32 %v2200_v55, %v2101_v28  ;;  %v291_v61 = vpop.f32.mrf.mxu1  ;;  %v2676_v32 = vmov 96  }
 0x11a   :  { %v464_v47 = vrot.slane %v442_v39, %v2836_v26  ;;  %v2862_v49 = vrot.slane %v450_v43, %v2850_v36  ;;  %v472_v50 = vcombine.high %v450_v43, %v450_v43  ;;  %v443_v51 = vcombine.high %v441_v38, %v441_v38  ;;  %2261 = vset.pattern.permute.xlu1 %v2676_v32 }
 0x11b   :  { %v457_v54 = vrot.slane %v441_v38, %v2836_v26  ;;  %v2114_v0 = vmul.f32 -1.442695, %v2877_v60  ;;  %v2886_v2 = vadd.f32 %v2101_v28, %v291_v61  ;;  %v2201_v3 = vpop.f32.mrf.mxu1  ;;  %2283 = vpow2.f32 %v2109_v59  ;;  %2260 = vset.pattern.permute.xlu0 %v2676_v32 }
 0x11c   :  { %797 = vrot.lane.b32.xlu0 %v2862_v49, %s2674_s3  ;;  %v2871_v56 = vrot.slane %v472_v50, %v2850_v36  ;;  %v2874_v57 = vrot.slane %v464_v47, %v2850_v36  ;;  %v474_v58 = vcombine.high %v464_v47, %v464_v47  ;;  %v471_v63 = vrot.slane %v443_v51, %v2836_v26  ;;  %v2272_v47 = vld [vmem:[#allocation9 + $0x8] sm:$0xff]  }
 0x11d   :  { %v2891_v4 = vrot.slane %v457_v54, %v2850_v36  ;;  %v473_v5 = vcombine.high %v457_v54, %v457_v54  ;;  %v2893_v6 = vadd.f32 %v2201_v3, %v2101_v28  ;;  %v294_v7 = vpop.f32.mrf.mxu1  ;;  %2285 = vpow2.f32 %v2114_v0  ;;  %2202 = vmatprep.subr.bf16.mxu0 %v2272_v47 }
 0x11e   :  { %801 = vrot.lane.b32.xlu1 %v2871_v56, %s2674_s3  ;;  %v2882_v62 = vrot.slane %v474_v58, %v2850_v36  ;;  %v2898_v8 = vrot.slane %v471_v63, %v2850_v36  ;;  %v475_v9 = vcombine.high %v471_v63, %v471_v63  ;;  %v2112_v10 = vmul.f32 -1.442695, %v2886_v2  ;;  %2203 = vmatpush3.bf16.msra.mxu0 %v2272_v47 }
 0x11f   :  { %v2115_v11 = vmul.f32 -1.442695, %v2893_v6  ;;  %v2902_v12 = vadd.f32 %v2101_v28, %v294_v7  ;;  %v2907_v13 = vrot.slane %v473_v5, %v2850_v36  ;;  %2204 = vmatprep.subr.bf16.mxu0 %v2273_v48 }
 0x120   :  { %799 = vrot.lane.b32.xlu0 %v2874_v57, %s2674_s3  ;;  %v2912_v15 = vrot.slane %v475_v9, %v2850_v36  ;;  %2287 = vpow2.f32 %v2112_v10 }
 0x121   :  { %v2278_v14 = vpop.eup %2277  ;;  %2289 = vpow2.f32 %v2115_v11  ;;  %v2113_v17 = vmul.f32 -1.442695, %v2902_v12 }
 0x122   :  { %803 = vrot.lane.b32.xlu1 %v2882_v62, %s2674_s3  ;;  %v332_v16 = vadd.f32 1.0, %v2278_v14  ;;  %2205 = vmatpush3.bf16.msra.mxu0 %v2273_v48 }
 0x123   :  { %2226 = vmatprep.subr.bf16.mxu0 %v2671_v1 }
 0x124   :  { %805 = vrot.lane.b32.xlu0 %v2891_v4, %s2674_s3  ;;  %v2280_v18 = vpop.eup %2279  ;;  %2291 = vrcp.f32 %v332_v16 }
 0x125   :  { %v2282_v19 = vpop.eup %2281  ;;  %2293 = vpow2.f32 %v2113_v17  ;;  %v330_v21 = vadd.f32 1.0, %v2280_v18 }
 0x126   :  { %807 = vrot.lane.b32.xlu1 %v2898_v8, %s2674_s3  ;;  %v333_v20 = vadd.f32 1.0, %v2282_v19 }
 0x128   :  { %809 = vrot.lane.b32.xlu0 %v2907_v13, %s2674_s3  ;;  %2295 = vrcp.f32 %v333_v20  ;;  %v2284_v22 = vpop.eup %2283 }
 0x129   :  { %2297 = vrcp.f32 %v330_v21  ;;  %v331_v25 = vadd.f32 1.0, %v2284_v22 }
 0x12a   :  { %811 = vrot.lane.b32.xlu1 %v2912_v15, %s2674_s3  ;;  %v2286_v23 = vpop.eup %2285 }
 0x12b   :  { %v336_v27 = vadd.f32 1.0, %v2286_v23  ;;  %2299 = vrcp.f32 %v331_v25 }
 0x12d   :  { %v2288_v28 = vpop.eup %2287  ;;  %2301 = vrcp.f32 %v336_v27 }
 0x12e   :  { %v2290_v30 = vpop.eup %2289  ;;  %v334_v33 = vadd.f32 1.0, %v2288_v28 }
 0x12f   :  { %v337_v37 = vadd.f32 1.0, %v2290_v30 }
 0x130   :  { %2303 = vrcp.f32 %v334_v33 }
 0x131   :  { %v2919_v31 = vpop.eup %2291  ;;  %2305 = vrcp.f32 %v337_v37 }
 0x132   :  { %366 = vrot.lane.b32.xlu0 %v2919_v31, %s2675_s5  ;;  %v2294_v35 = vpop.eup %2293 }
 0x133   :  { %v335_v39 = vadd.f32 1.0, %v2294_v35 }
 0x135   :  { %v2923_v38 = vpop.eup %2295  ;;  %2307 = vrcp.f32 %v335_v39 }
 0x136   :  { %398 = vrot.lane.b32.xlu0 %v2919_v31, %s2677_s23  ;;  %368 = vrot.lane.b32.xlu1 %v2923_v38, %s2675_s5  ;;  %v2929_v40 = vpop.eup %2297 }
 0x138   :  { %v2935_v42 = vpop.eup %2299 }
 0x13a   :  { %362 = vrot.lane.b32.xlu0 %v2929_v40, %s2675_s5  ;;  %400 = vrot.lane.b32.xlu1 %v2923_v38, %s2677_s23  ;;  %v2941_v43 = vpop.eup %2301 }
 0x13d   :  { %v2947_v44 = vpop.eup %2303 }
 0x13e   :  { %394 = vrot.lane.b32.xlu0 %v2929_v40, %s2677_s23  ;;  %364 = vrot.lane.b32.xlu1 %v2935_v42, %s2675_s5  ;;  %v2949_v45 = vpop.eup %2305 }
 0x142   :  { %374 = vrot.lane.b32.xlu0 %v2941_v43, %s2675_s5  ;;  %396 = vrot.lane.b32.xlu1 %v2935_v42, %s2677_s23  ;;  %v2955_v50 = vpop.eup %2307 }
 0x146   :  { %370 = vrot.lane.b32.xlu0 %v2947_v44, %s2675_s5  ;;  %376 = vrot.lane.b32.xlu1 %v2949_v45, %s2675_s5 }
 0x14a   :  { %402 = vrot.lane.b32.xlu0 %v2947_v44, %s2677_s23  ;;  %372 = vrot.lane.b32.xlu1 %v2955_v50, %s2675_s5 }
 0x14e   :  { %406 = vrot.lane.b32.xlu0 %v2941_v43, %s2677_s23  ;;  %404 = vrot.lane.b32.xlu1 %v2955_v50, %s2677_s23 }
 0x152   :  { %408 = vrot.lane.b32.xlu1 %v2949_v45, %s2677_s23 }
 0x18e   :  { %v798_v51 = vpop.permute.xlu0 %797 }
 0x18f   :  { %v821_v54 = vadd.f32 %v798_v51, %v2854_v41 }
 0x190   :  { %v802_v52 = vpop.permute.xlu1 %801 }
 0x191   :  { %v823_v58 = vadd.f32 %v802_v52, %v2847_v34  ;;  %v829_v63 = vmax.f32 %v821_v54, 0.0 }
 0x192   :  { %v800_v55 = vpop.permute.xlu0 %799 }
 0x193   :  { %v822_v59 = vadd.f32 %v800_v55, %v2865_v53  ;;  %v831_v7 = vmax.f32 %v823_v58, 0.0 }
 0x194   :  { %v804_v61 = vpop.permute.xlu1 %803 }
 0x195   :  { %v830_v0 = vmax.f32 %v822_v59, 0.0  ;;  %v824_v3 = vadd.f32 %v804_v61, %v2858_v46 }
 0x196   :  { %v806_v5 = vpop.permute.xlu0 %805 }
 0x197   :  { %v832_v9 = vmax.f32 %v824_v3, 0.0  ;;  %v825_v10 = vadd.f32 %v806_v5, %v2886_v2  ;;  %v837_v11 = vpack.c.bf16 %v830_v0, %v829_v63 }
 0x198   :  { %v808_v14 = vpop.permute.xlu1 %807 }
 0x199   :  { %v826_v16 = vadd.f32 %v808_v14, %v2902_v12  ;;  %856 = vrot.lane.b32.xlu0 %v837_v11, %s2667_s26  ;;  %v838_v17 = vpack.c.bf16 %v832_v9, %v831_v7  ;;  %v833_v19 = vmax.f32 %v825_v10, 0.0 }
 0x19a   :  { %v810_v18 = vpop.permute.xlu0 %809 }
 0x19b   :  { %v834_v20 = vmax.f32 %v826_v16, 0.0  ;;  %v827_v21 = vadd.f32 %v810_v18, %v2877_v60  ;;  %858 = vrot.lane.b32.xlu1 %v838_v17, %s2667_s26 }
 0x19c   :  { %v812_v22 = vpop.permute.xlu1 %811 }
 0x19d   :  { %v828_v23 = vadd.f32 %v812_v22, %v2893_v6  ;;  %v839_v25 = vpack.c.bf16 %v834_v20, %v833_v19  ;;  %v835_v27 = vmax.f32 %v827_v21, 0.0 }
 0x19f   :  { %v836_v28 = vmax.f32 %v828_v23, 0.0  ;;  %860 = vrot.lane.b32.xlu0 %v839_v25, %s2667_s26 }
 0x1a1   :  { %v840_v30 = vpack.c.bf16 %v836_v28, %v835_v27  ;;  %v2678_v27 = vmov 100  }
 0x1a3   :  { %862 = vrot.lane.b32.xlu1 %v840_v30, %s2667_s26 }
 0x1a4   :  { %v367_v32 = vpop.permute.xlu0 %366 }
 0x1a5   :  { %v388_v0 = vmul.f32 %v2919_v31, %v367_v32 }
 0x1a8   :  { %v399_v33 = vpop.permute.xlu0 %398  ;;  %v369_v35 = vpop.permute.xlu1 %368 }
 0x1a9   :  { %v389_v54 = vmul.f32 %v2923_v38, %v369_v35  ;;  %v420_v7 = vmul.f32 %v399_v33, %v388_v0 }
 0x1ac   :  { %v363_v37 = vpop.permute.xlu0 %362  ;;  %v401_v39 = vpop.permute.xlu1 %400 }
 0x1ad   :  { %v386_v47 = vmul.f32 %v2929_v40, %v363_v37  ;;  %v421_v61 = vmul.f32 %v401_v39, %v389_v54 }
 0x1b0   :  { %v395_v48 = vpop.permute.xlu0 %394  ;;  %v365_v51 = vpop.permute.xlu1 %364 }
 0x1b1   :  { %v418_v52 = vmul.f32 %v395_v48, %v386_v47  ;;  %v387_v55 = vmul.f32 %v2935_v42, %v365_v51 }
 0x1b3   :  { %478 = vperm.xlu0 %2260, %v418_v52  }
 0x1b4   :  { %v375_v58 = vpop.permute.xlu0 %374  ;;  %v397_v59 = vpop.permute.xlu1 %396 }
 0x1b5   :  { %v419_v63 = vmul.f32 %v397_v59, %v387_v55  ;;  %v392_v16 = vmul.f32 %v2941_v43, %v375_v58 }
 0x1b7   :  { %493 = vperm.xlu0 %2260, %v421_v61   ;;  %483 = vperm.xlu1 %2261, %v419_v63  }
 0x1b8   :  { %v371_v3 = vpop.permute.xlu0 %370  ;;  %v377_v5 = vpop.permute.xlu1 %376 }
 0x1b9   :  { %v390_v9 = vmul.f32 %v2947_v44, %v371_v3  ;;  %v393_v22 = vmul.f32 %v2949_v45, %v377_v5 }
 0x1bb   :  { %488 = vperm.xlu1 %2261, %v420_v7  }
 0x1bc   :  { %v403_v10 = vpop.permute.xlu0 %402  ;;  %v373_v11 = vpop.permute.xlu1 %372 }
 0x1bd   :  { %v422_v14 = vmul.f32 %v403_v10, %v390_v9  ;;  %v391_v17 = vmul.f32 %v2955_v50, %v373_v11 }
 0x1bf   :  { %498 = vperm.xlu1 %2261, %v422_v14  }
 0x1c0   :  { %v407_v18 = vpop.permute.xlu0 %406  ;;  %v405_v19 = vpop.permute.xlu1 %404 }
 0x1c1   :  { %v424_v20 = vmul.f32 %v407_v18, %v392_v16  ;;  %v423_v21 = vmul.f32 %v405_v19, %v391_v17 }
 0x1c3   :  { %508 = vperm.xlu1 %2261, %v424_v20   ;;  %503 = vperm.xlu0 %2260, %v423_v21  }
 0x1c4   :  { %v409_v23 = vpop.permute.xlu1 %408 }
 0x1c5   :  { %v425_v25 = vmul.f32 %v409_v23, %v393_v22 }
 0x1c7   :  { %513 = vperm.xlu0 %2260, %v425_v25   ;;  %2263 = vset.pattern.permute.xlu1 %v2678_v27 }
 0x1cb   :  { %2262 = vset.pattern.permute.xlu0 %v2678_v27 }
 0x20b   :  { %v857_v28 = vpop.permute.xlu0 %856 }
 0x20c   :  { %2206 = vmatprep.mubr.msk.bf16.mxu0 %vm157_vm1, %v857_v28 }
 0x20d   :  { %v859_v30 = vpop.permute.xlu1 %858 }
 0x20e   :  { %2207 = vmatmul.mubr.msk.bf16.vlgmr.msra.gmra.mxu0 %vm157_vm1, %v859_v30 }
 0x211   :  { %v861_v32 = vpop.permute.xlu0 %860 }
 0x212   :  { %2210 = vmatprep.mubr.msk.bf16.mxu0 %vm157_vm1, %v861_v32 }
 0x215   :  { %v863_v33 = vpop.permute.xlu1 %862 }
 0x216   :  { %2211 = vmatmul.mubr.msk.bf16.gmra.mxu0 %vm157_vm1, %v863_v33 }
 0x217   :  { %2228 = vmatprep.mubr.msk.bf16.mxu0 %vm2672_vm0, %v2671_v1 }
 0x22e   :  { %v479_v35 = vpop.permute.xlu0 %478 }
 0x22f   :  { %v516_v37 = vmul.f32 %v479_v35, %v2854_v41 }
 0x231   :  { %v564_v39 = vmul.f32 %v2862_v49, %v516_v37 }
 0x232   :  { %v494_v47 = vpop.permute.xlu0 %493  ;;  %v484_v48 = vpop.permute.xlu1 %483 }
 0x233   :  { %v519_v51 = vmul.f32 %v494_v47, %v2858_v46  ;;  %v517_v52 = vmul.f32 %v484_v48, %v2865_v53  ;;  %v572_v54 = vsel %vm157_vm1, %v564_v39, 0.0 }
 0x234   :  { %573 = vadd.xlane.f32.xlu1 %v572_v54 }
 0x235   :  { %v567_v55 = vmul.f32 %v2882_v62, %v519_v51  ;;  %v565_v58 = vmul.f32 %v2874_v57, %v517_v52 }
 0x236   :  { %v489_v59 = vpop.permute.xlu1 %488 }
 0x237   :  { %v518_v1 = vmul.f32 %v489_v59, %v2847_v34  ;;  %v581_v61 = vsel %vm157_vm1, %v567_v55, 0.0  ;;  %v575_v49 = vsel %vm157_vm1, %v565_v58, 0.0  ;;  %v3037_v58 = vld [vmem:[%s3559_s7] ss:$0 sm:$0xff]  ;;  %s2680_s7 = smov 96  }
 0x238   :  { %582 = vadd.xlane.f32.xlu1 %v581_v61  ;;  %576 = vadd.xlane.f32.xlu0 %v575_v49 }
 0x239   :  { %v566_v63 = vmul.f32 %v2871_v56, %v518_v1 }
 0x23a   :  { %v499_v0 = vpop.permute.xlu1 %498 }
 0x23b   :  { %v520_v3 = vmul.f32 %v499_v0, %v2886_v2  ;;  %v578_v5 = vsel %vm157_vm1, %v566_v63, 0.0 }
 0x23c   :  { %579 = vadd.xlane.f32.xlu0 %v578_v5 }
 0x23d   :  { %v568_v62 = vmul.f32 %v2891_v4, %v520_v3 }
 0x23e   :  { %v504_v57 = vpop.permute.xlu0 %503  ;;  %v509_v7 = vpop.permute.xlu1 %508 }
 0x23f   :  { %v521_v9 = vmul.f32 %v504_v57, %v2902_v12  ;;  %v522_v10 = vmul.f32 %v509_v7, %v2877_v60  ;;  %v584_v11 = vsel %vm157_vm1, %v568_v62, 0.0 }
 0x240   :  { %585 = vadd.xlane.f32.xlu0 %v584_v11 }
 0x241   :  { %v569_v14 = vmul.f32 %v2898_v8, %v521_v9  ;;  %v570_v56 = vmul.f32 %v2907_v13, %v522_v10  ;;  %v2679_v8 = vmov 99  }
 0x242   :  { %v514_v16 = vpop.permute.xlu0 %513 }
 0x243   :  { %v523_v17 = vmul.f32 %v514_v16, %v2893_v6  ;;  %v587_v18 = vsel %vm157_vm1, %v569_v14, 0.0  ;;  %v590_v4 = vsel %vm157_vm1, %v570_v56, 0.0 }
 0x244   :  { %588 = vadd.xlane.f32.xlu1 %v587_v18  ;;  %591 = vadd.xlane.f32.xlu0 %v590_v4 }
 0x245   :  { %v571_v19 = vmul.f32 %v2912_v15, %v523_v17 }
 0x247   :  { %v593_v20 = vsel %vm157_vm1, %v571_v19, 0.0 }
 0x248   :  { %594 = vadd.xlane.f32.xlu1 %v593_v20 }
 0x259   :  { %1136 = vperm.xlu1 %2263, %v2935_v42  }
 0x25a   :  { %1132 = vperm.xlu0 %2262, %v2929_v40  }
 0x25d   :  { %1140 = vperm.xlu1 %2263, %v2919_v31  }
 0x25e   :  { %2265 = vset.pattern.permute.xlu0 %v2679_v8 }
 0x25f   :  { %1056 = vperm.xlu0 %2265, %v2935_v42  }
 0x261   :  { %1144 = vperm.xlu1 %2263, %v2923_v38  }
 0x263   :  { %1068 = vperm.xlu0 %2265, %v2947_v44  }
 0x265   :  { %1148 = vperm.xlu1 %2263, %v2947_v44  }
 0x267   :  { %1076 = vperm.xlu0 %2265, %v2941_v43  }
 0x269   :  { %1152 = vperm.xlu1 %2263, %v2955_v50  }
 0x26d   :  { %1156 = vperm.xlu1 %2263, %v2941_v43  }
 0x271   :  { %1160 = vperm.xlu1 %2263, %v2949_v45  }
 0x275   :  { %2264 = vset.pattern.permute.xlu1 %v2679_v8 }
 0x276   :  { %1052 = vperm.xlu1 %2264, %v2929_v40  }
 0x27a   :  { %1060 = vperm.xlu1 %2264, %v2919_v31  }
 0x27e   :  { %1064 = vperm.xlu1 %2264, %v2923_v38  }
 0x282   :  { %1072 = vperm.xlu1 %2264, %v2955_v50  }
 0x286   :  { %1080 = vperm.xlu1 %2264, %v2949_v45  }
 0x2bd   :  { %v574_v13 = vpop.xlane.xlu1 %573 }
 0x2be   :  { %v596_v15 = vrot.slane %v574_v13, 4 }
 0x2c0   :  { %v597_v21 = vmax.f32 %v574_v13, %v596_v15 }
 0x2c1   :  { %v577_v22 = vpop.xlane.xlu0 %576  ;;  %v583_v23 = vpop.xlane.xlu1 %582 }
 0x2c2   :  { %v598_v25 = vrot.slane %v597_v21, 2  ;;  %v602_v27 = vrot.slane %v577_v22, 4  ;;  %v614_v28 = vrot.slane %v583_v23, 4 }
 0x2c4   :  { %v599_v30 = vmax.f32 %v597_v21, %v598_v25  ;;  %v603_v32 = vmax.f32 %v577_v22, %v602_v27  ;;  %v615_v33 = vmax.f32 %v583_v23, %v614_v28 }
 0x2c5   :  { %v580_v35 = vpop.xlane.xlu0 %579 }
 0x2c6   :  { %v600_v37 = vrot.slane %v599_v30, 1  ;;  %v604_v39 = vrot.slane %v603_v32, 2  ;;  %v616_v47 = vrot.slane %v615_v33, 2  ;;  %v608_v48 = vrot.slane %v580_v35, 4 }
 0x2c8   :  { %v601_v51 = vmax.f32 %v599_v30, %v600_v37  ;;  %v605_v52 = vmax.f32 %v603_v32, %v604_v39  ;;  %v617_v54 = vmax.f32 %v615_v33, %v616_v47  ;;  %v609_v55 = vmax.f32 %v580_v35, %v608_v48 }
 0x2c9   :  { %v3039_v59 = vpop.xlane.xlu0 %585 }
 0x2ca   :  { %v644_v61 = vsub.f32 %v574_v13, %v601_v51  ;;  %v606_v49 = vrot.slane %v605_v52, 1  ;;  %v618_v63 = vrot.slane %v617_v54, 1  ;;  %v610_v0 = vrot.slane %v609_v55, 2 }
 0x2cb   :  { %v620_v3 = vrot.slane %v3039_v59, 4 }
 0x2cc   :  { %v652_v57 = vmul.f32 1.442695, %v644_v61  ;;  %v607_v7 = vmax.f32 %v605_v52, %v606_v49  ;;  %v619_v9 = vmax.f32 %v617_v54, %v618_v63  ;;  %v611_v10 = vmax.f32 %v609_v55, %v610_v0 }
 0x2cd   :  { %v621_v11 = vmax.f32 %v3039_v59, %v620_v3  ;;  %v3045_v16 = vpop.xlane.xlu0 %591  ;;  %v3047_v17 = vpop.xlane.xlu1 %588 }
 0x2ce   :  { %v2208_v1 = vpop.f32.mrf.mxu0  ;;  %2309 = vpow2.f32 %v652_v57  ;;  %v645_v18 = vsub.f32 %v577_v22, %v607_v7  ;;  %v647_v4 = vsub.f32 %v583_v23, %v619_v9  ;;  %v612_v19 = vrot.slane %v611_v10, 1 }
 0x2cf   :  { %v931_v5 = vadd.f32 %v2208_v1, %v3037_v58  ;;  %v622_v8 = vrot.slane %v621_v11, 2  ;;  %v632_v15 = vrot.slane %v3045_v16, 4  ;;  %v626_v28 = vrot.slane %v3047_v17, 4 }
 0x2d0   :  { %v922_v62 = vpop.f32.mrf.mxu0  ;;  %v654_v21 = vmul.f32 1.442695, %v645_v18  ;;  %v658_v25 = vmul.f32 1.442695, %v647_v4  ;;  %v613_v27 = vmax.f32 %v611_v10, %v612_v19 }
 0x2d1   :  { %v2125_v14 = vmul.f32 -1.442695, %v931_v5  ;;  %v923_v56 = vadd.f32 %v3037_v58, %v922_v62  ;;  %v623_v32 = vmax.f32 %v621_v11, %v622_v8  ;;  %v633_v33 = vmax.f32 %v3045_v16, %v632_v15  ;;  %v3053_v23 = vpop.xlane.xlu1 %594 }
 0x2d2   :  { %v2209_v20 = vpop.f32.mrf.mxu0  ;;  %v646_v37 = vsub.f32 %v580_v35, %v613_v27  ;;  %v627_v39 = vmax.f32 %v3047_v17, %v626_v28  ;;  %v638_v49 = vrot.slane %v3053_v23, 4 }
 0x2d3   :  { %2311 = vpow2.f32 %v2125_v14  ;;  %v2123_v13 = vmul.f32 -1.442695, %v923_v56  ;;  %v934_v22 = vadd.f32 %v2209_v20, %v3037_v58  ;;  %v624_v51 = vrot.slane %v623_v32, 1 }
 0x2d4   :  { %v925_v30 = vpop.f32.mrf.mxu0  ;;  %v634_v52 = vrot.slane %v633_v33, 2  ;;  %v656_v55 = vmul.f32 1.442695, %v646_v37  ;;  %v628_v1 = vrot.slane %v627_v39, 2  ;;  %v639_v62 = vmax.f32 %v3053_v23, %v638_v49 }
 0x2d5   :  { %2313 = vpow2.f32 %v2123_v13  ;;  %v926_v47 = vadd.f32 %v3037_v58, %v925_v30  ;;  %v2126_v54 = vmul.f32 -1.442695, %v934_v22  ;;  %v625_v0 = vmax.f32 %v623_v32, %v624_v51 }
 0x2d6   :  { %2315 = vpow2.f32 %v654_v21  ;;  %v2212_v48 = vpop.f32.mrf.mxu0  ;;  %v635_v3 = vmax.f32 %v633_v33, %v634_v52  ;;  %v629_v5 = vmax.f32 %v627_v39, %v628_v1  ;;  %v640_v56 = vrot.slane %v639_v62, 2 }
 0x2d7   :  { %2317 = vpow2.f32 %v658_v25  ;;  %v2124_v61 = vmul.f32 -1.442695, %v926_v47  ;;  %v947_v35 = vadd.f32 %v2212_v48, %v3037_v58  ;;  %v648_v9 = vsub.f32 %v3039_v59, %v625_v0 }
 0x2d8   :  { %v938_v63 = vpop.f32.mrf.mxu0  ;;  %2319 = vpow2.f32 %v2126_v54  ;;  %v636_v10 = vrot.slane %v635_v3, 1  ;;  %v630_v14 = vrot.slane %v629_v5, 1  ;;  %v641_v13 = vmax.f32 %v639_v62, %v640_v56 }
 0x2d9   :  { %2321 = vpow2.f32 %v656_v55  ;;  %v939_v57 = vadd.f32 %v3037_v58, %v938_v63  ;;  %v2129_v11 = vmul.f32 -1.442695, %v947_v35  ;;  %v660_v19 = vmul.f32 1.442695, %v648_v9 }
 0x2da   :  { %v2213_v7 = vpop.f32.mrf.mxu0  ;;  %2323 = vpow2.f32 %v2124_v61  ;;  %v637_v20 = vmax.f32 %v635_v3, %v636_v10  ;;  %v631_v8 = vmax.f32 %v629_v5, %v630_v14  ;;  %v642_v30 = vrot.slane %v641_v13, 1 }
 0x2db   :  { %v2127_v18 = vmul.f32 -1.442695, %v939_v57  ;;  %2325 = vpow2.f32 %v2129_v11  ;;  %v950_v15 = vadd.f32 %v2213_v7, %v3037_v58  ;;  %v3063_v21 = vpop.eup %2309 }
 0x2dc   :  { %v941_v4 = vpop.f32.mrf.mxu0  ;;  %v650_v59 = vsub.f32 %v3045_v16, %v637_v20  ;;  %v649_v28 = vsub.f32 %v3047_v17, %v631_v8  ;;  %v668_v32 = vrot.slane %v3063_v21, 4  ;;  %v643_v48 = vmax.f32 %v641_v13, %v642_v30 }
 0x2dd   :  { %2327 = vpow2.f32 %v2127_v18  ;;  %v942_v25 = vadd.f32 %v3037_v58, %v941_v4  ;;  %v2130_v33 = vmul.f32 -1.442695, %v950_v15 }
 0x2de   :  { %2329 = vpow2.f32 %v660_v19  ;;  %v664_v37 = vmul.f32 1.442695, %v650_v59  ;;  %v662_v47 = vmul.f32 1.442695, %v649_v28  ;;  %v669_v51 = vadd.f32 %v3063_v21, %v668_v32 }
 0x2df   :  { %2331 = vpow2.f32 %v2130_v33  ;;  %v2128_v58 = vmul.f32 -1.442695, %v942_v25  ;;  %v651_v17 = vsub.f32 %v3053_v23, %v643_v48 }
 0x2e0   :  { %v2312_v27 = vpop.eup %2311  ;;  %v670_v55 = vrot.slane %v669_v51, 2 }
 0x2e1   :  { %v979_v22 = vadd.f32 1.0, %v2312_v27  ;;  %v666_v63 = vmul.f32 1.442695, %v651_v17 }
 0x2e2   :  { %v2314_v39 = vpop.eup %2313  ;;  %v671_v0 = vadd.f32 %v670_v55, %v669_v51 }
 0x2e3   :  { %v3070_v52 = vpop.eup %2315  ;;  %2333 = vrcp.f32 %v979_v22  ;;  %v977_v16 = vadd.f32 1.0, %v2314_v39 }
 0x2e4   :  { %v3072_v54 = vpop.eup %2317  ;;  %2335 = vpow2.f32 %v664_v37  ;;  %v674_v1 = vrot.slane %v3070_v52, 4  ;;  %v672_v23 = vrot.slane %v671_v0, 1 }
 0x2e5   :  { %2337 = vrcp.f32 %v977_v16  ;;  %v686_v61 = vrot.slane %v3072_v54, 4  ;;  %v2320_v49 = vpop.eup %2319 }
 0x2e6   :  { %2339 = vpow2.f32 %v662_v47  ;;  %v675_v3 = vadd.f32 %v3070_v52, %v674_v1  ;;  %v3078_v35 = vpop.eup %2321  ;;  %v980_v5 = vadd.f32 1.0, %v2320_v49  ;;  %v673_v56 = vadd.f32 %v672_v23, %v671_v0 }
 0x2e7   :  { %2341 = vpow2.f32 %v2128_v58  ;;  %v687_v62 = vadd.f32 %v3072_v54, %v686_v61  ;;  %v2324_v57 = vpop.eup %2323  ;;  %v680_v9 = vrot.slane %v3078_v35, 4 }
 0x2e8   :  { %2343 = vpow2.f32 %v666_v63  ;;  %v676_v7 = vrot.slane %v675_v3, 2  ;;  %v978_v10 = vadd.f32 1.0, %v2324_v57  ;;  %v2326_v14 = vpop.eup %2325 }
 0x2e9   :  { %2345 = vrcp.f32 %v980_v5  ;;  %v688_v11 = vrot.slane %v687_v62, 2  ;;  %v681_v4 = vadd.f32 %v3078_v35, %v680_v9  ;;  %v983_v20 = vadd.f32 1.0, %v2326_v14 }
 0x2ea   :  { %v677_v18 = vadd.f32 %v676_v7, %v675_v3  ;;  %v2328_v19 = vpop.eup %2327  ;;  %2347 = vrcp.f32 %v978_v10 }
 0x2eb   :  { %v689_v8 = vadd.f32 %v688_v11, %v687_v62  ;;  %v3083_v13 = vpop.eup %2329  ;;  %v981_v15 = vadd.f32 1.0, %v2328_v19  ;;  %2349 = vrcp.f32 %v673_v56  ;;  %v682_v25 = vrot.slane %v681_v4, 2 }
 0x2ec   :  { %v678_v59 = vrot.slane %v677_v18, 1  ;;  %2351 = vrcp.f32 %v983_v20  ;;  %v692_v28 = vrot.slane %v3083_v13, 4  ;;  %v2332_v33 = vpop.eup %2331 }
 0x2ed   :  { %v690_v27 = vrot.slane %v689_v8, 1  ;;  %2353 = vrcp.f32 %v981_v15  ;;  %v683_v32 = vadd.f32 %v682_v25, %v681_v4  ;;  %v984_v47 = vadd.f32 1.0, %v2332_v33 }
 0x2ee   :  { %v679_v30 = vadd.f32 %v678_v59, %v677_v18  ;;  %v693_v37 = vadd.f32 %v3083_v13, %v692_v28 }
 0x2ef   :  { %v691_v22 = vadd.f32 %v690_v27, %v689_v8  ;;  %v684_v48 = vrot.slane %v683_v32, 1 }
 0x2f0   :  { %v3087_v39 = vpop.eup %2333  ;;  %2355 = vrcp.f32 %v679_v30  ;;  %v694_v58 = vrot.slane %v693_v37, 2 }
 0x2f1   :  { %v3089_v51 = vpop.eup %2335  ;;  %v1883_v16 = vpack.c.bf16 %v3087_v39, %v3087_v39  ;;  %2357 = vrcp.f32 %v691_v22  ;;  %v685_v55 = vadd.f32 %v684_v48, %v683_v32 }
 0x2f2   :  { %v3093_v17 = vpop.eup %2337  ;;  %2359 = vrcp.f32 %v984_v47  ;;  %v704_v1 = vrot.slane %v3089_v51, 4  ;;  %v695_v63 = vadd.f32 %v694_v58, %v693_v37 }
 0x2f3   :  { %v3096_v61 = vpop.eup %2339  ;;  %1891 = vst.msk [vmem:[#allocation13 + $0x8] sm:$0xf] %vm1872_vm2, %v1883_v16  ;;  %v1881_v49 = vpack.c.bf16 %v3093_v17, %v3093_v17  ;;  %2361 = vrcp.f32 %v685_v55 }
 0x2f4   :  { %v2342_v0 = vpop.eup %2341  ;;  %v698_v3 = vrot.slane %v3096_v61, 4  ;;  %v705_v5 = vadd.f32 %v3089_v51, %v704_v1  ;;  %v696_v23 = vrot.slane %v695_v63, 1 }
 0x2f5   :  { %v3103_v62 = vpop.eup %2343  ;;  %1889 = vst.msk [vmem:[#allocation13] sm:$0xf] %vm1872_vm2, %v1881_v49  ;;  %v982_v57 = vadd.f32 1.0, %v2342_v0 }
 0x2f6   :  { %v3106_v7 = vpop.eup %2345  ;;  %v699_v9 = vadd.f32 %v3096_v61, %v698_v3  ;;  %v706_v10 = vrot.slane %v705_v5, 2  ;;  %v710_v11 = vrot.slane %v3103_v62, 4  ;;  %v697_v56 = vadd.f32 %v696_v23, %v695_v63 }
 0x2f7   :  { %v1884_v14 = vpack.c.bf16 %v3106_v7, %v3106_v7  ;;  %2363 = vrcp.f32 %v982_v57  ;;  %v3112_v18 = vpop.eup %2347 }
 0x2f8   :  { %v700_v4 = vrot.slane %v699_v9, 2  ;;  %v707_v19 = vadd.f32 %v706_v10, %v705_v5  ;;  %v711_v20 = vadd.f32 %v3103_v62, %v710_v11  ;;  %v2350_v8 = vpop.eup %2349  ;;  %v1882_v15 = vpack.c.bf16 %v3112_v18, %v3112_v18 }
 0x2f9   :  { %1892 = vst.msk [vmem:[#allocation13 + $0xc] sm:$0xf] %vm1872_vm2, %v1884_v14  ;;  %2365 = vrcp.f32 %v697_v56  ;;  %v3118_v59 = vpop.eup %2351  ;;  %v724_v25 = vmul.f32 %v2350_v8, %v3063_v21  ;;  %v3130_v21 = vpop.permute.xlu1 %1136 }
 0x2fa   :  { %v701_v27 = vadd.f32 %v700_v4, %v699_v9  ;;  %v708_v28 = vrot.slane %v707_v19, 1  ;;  %v712_v30 = vrot.slane %v711_v20, 2  ;;  %v3121_v32 = vpop.eup %2353  ;;  %1890 = vst.msk [vmem:[#allocation13 + $0x4] sm:$0xf] %vm1872_vm2, %v1882_v15  ;;  %v1887_v33 = vpack.c.bf16 %v3118_v59, %v3118_v59 }
 0x2fb   :  { %v1885_v22 = vpack.c.bf16 %v3121_v32, %v3121_v32  ;;  %v732_v37 = vmul.f32 %v724_v25, %v2854_v41 }
 0x2fc   :  { %v702_v47 = vrot.slane %v701_v27, 1  ;;  %v709_v48 = vadd.f32 %v708_v28, %v707_v19  ;;  %1895 = vst.msk [vmem:[#allocation13 + $0x18] sm:$0xf] %vm1872_vm2, %v1887_v33  ;;  %v713_v58 = vadd.f32 %v712_v30, %v711_v20  ;;  %v2274_v33 = vld [vmem:[#allocation11 + $0x8] sm:$0xff]  }
 0x2fd   :  { %v2356_v16 = vpop.eup %2355  ;;  %1893 = vst.msk [vmem:[#allocation13 + $0x10] sm:$0xf] %vm1872_vm2, %v1885_v22  ;;  %v741_v1 = vsel %vm740_vm3, %v732_v37, 0.0  ;;  %v3145_v19 = vpop.permute.xlu1 %1140  ;;  %2214 = vmatprep.subr.bf16.mxu1 %v2274_v33 }
 0x2fe   :  { %v2358_v55 = vpop.eup %2357  ;;  %v725_v49 = vmul.f32 %v2356_v16, %v3070_v52  ;;  %v703_v63 = vadd.f32 %v702_v47, %v701_v27  ;;  %2367 = vrcp.f32 %v709_v48  ;;  %v742_v41 = vrot.slane %v741_v1, 4  ;;  %2215 = vmatpush3.bf16.msra.mxu1 %v2274_v33 }
 0x2ff   :  { %v3135_v0 = vpop.eup %2359  ;;  %v727_v3 = vmul.f32 %v2358_v55, %v3072_v54  ;;  %v714_v5 = vrot.slane %v713_v58, 1 }
 0x300   :  { %v733_v57 = vmul.f32 %v725_v49, %v2865_v53  ;;  %v1888_v23 = vpack.c.bf16 %v3135_v0, %v3135_v0  ;;  %2369 = vrcp.f32 %v703_v63  ;;  %v2362_v9 = vpop.eup %2361  ;;  %v743_v10 = vadd.f32 %v742_v41, %v741_v1  ;;  %v3159_v63 = vpop.permute.xlu0 %1132 }
 0x301   :  { %v735_v11 = vmul.f32 %v727_v3, %v2858_v46  ;;  %v715_v14 = vadd.f32 %v714_v5, %v713_v58  ;;  %v726_v56 = vmul.f32 %v2362_v9, %v3078_v35  ;;  %v3156_v1 = vpop.permute.xlu1 %1144 }
 0x302   :  { %v748_v52 = vsel %vm740_vm3, %v733_v57, 0.0  ;;  %1896 = vst.msk [vmem:[#allocation13 + $0x1c] sm:$0xf] %vm1872_vm2, %v1888_v23  ;;  %v744_v4 = vrot.slane %v743_v10, 2 }
 0x303   :  { %v749_v54 = vrot.slane %v748_v52, 4  ;;  %v762_v53 = vsel %vm740_vm3, %v735_v11, 0.0  ;;  %2371 = vrcp.f32 %v715_v14  ;;  %v734_v8 = vmul.f32 %v726_v56, %v2847_v34 }
 0x304   :  { %v3148_v20 = vpop.eup %2363  ;;  %v763_v15 = vrot.slane %v762_v53, 4  ;;  %v745_v46 = vadd.f32 %v744_v4, %v743_v10 }
 0x305   :  { %v750_v25 = vadd.f32 %v749_v54, %v748_v52  ;;  %v1886_v27 = vpack.c.bf16 %v3148_v20, %v3148_v20  ;;  %v755_v35 = vsel %vm740_vm3, %v734_v8, 0.0  ;;  %v2275_v8 = vld [vmem:[#allocation11] sm:$0xff]  }
 0x306   :  { %v2366_v28 = vpop.eup %2365  ;;  %v764_v30 = vadd.f32 %v763_v15, %v762_v53  ;;  %v746_v22 = vrot.slane %v745_v46, 1  ;;  %v756_v47 = vrot.slane %v755_v35, 4  ;;  %2216 = vmatprep.subr.bf16.mxu1 %v2275_v8 }
 0x307   :  { %v751_v37 = vrot.slane %v750_v25, 2  ;;  %1894 = vst.msk [vmem:[#allocation13 + $0x14] sm:$0xf] %vm1872_vm2, %v1886_v27  ;;  %v728_v48 = vmul.f32 %v2366_v28, %v3083_v13  ;;  %2217 = vmatpush3.bf16.msra.mxu1 %v2275_v8 }
 0x308   :  { %v765_v16 = vrot.slane %v764_v30, 2  ;;  %v747_v34 = vadd.f32 %v746_v22, %v745_v46  ;;  %v757_v55 = vadd.f32 %v756_v47, %v755_v35 }
 0x309   :  { %v752_v58 = vadd.f32 %v751_v37, %v750_v25  ;;  %v736_v49 = vmul.f32 %v728_v48, %v2886_v2  ;;  %v3168_v25 = vpop.permute.xlu1 %1148 }
 0x30a   :  { %v766_v41 = vadd.f32 %v765_v16, %v764_v30  ;;  %v1179_v5 = vmul.f32 %v3159_v63, %v747_v34  ;;  %v758_v23 = vrot.slane %v757_v55, 2 }
 0x30b   :  { %v2368_v3 = vpop.eup %2367  ;;  %v753_v57 = vrot.slane %v752_v58, 1  ;;  %v769_v13 = vsel %vm740_vm3, %v736_v49, 0.0 }
 0x30c   :  { %v767_v9 = vrot.slane %v766_v41, 1  ;;  %v770_v10 = vrot.slane %v769_v13, 4  ;;  %v730_v11 = vmul.f32 %v2368_v3, %v3089_v51  ;;  %v759_v56 = vadd.f32 %v758_v23, %v757_v55  ;;  %1195 = vrot.lane.b32.xlu0 %v1179_v5, %s2680_s7  ;;  %v2276_v5 = vld [vmem:[%s3564_s12] sm:$0xff]  }
 0x30d   :  { %v2370_v14 = vpop.eup %2369  ;;  %v754_v52 = vadd.f32 %v753_v57, %v752_v58  ;;  %v3178_v55 = vpop.permute.xlu1 %1152  ;;  %2227 = vmatpush3.bf16.msra.mxu0 %v2276_v5  ;;  %v2442_v5 = vld [vmem:[#allocation6] sm:$0xff] }
 0x30e   :  { %v768_v2 = vadd.f32 %v767_v9, %v766_v41  ;;  %v771_v4 = vadd.f32 %v770_v10, %v769_v13  ;;  %v729_v54 = vmul.f32 %v2370_v14, %v3096_v61  ;;  %v738_v53 = vmul.f32 %v730_v11, %v2877_v60 }
 0x30f   :  { %v1180_v15 = vmul.f32 %v3130_v21, %v754_v52  ;;  %v760_v46 = vrot.slane %v759_v56, 1 }
 0x310   :  { %v2372_v27 = vpop.eup %2371  ;;  %v772_v51 = vrot.slane %v771_v4, 2  ;;  %v737_v28 = vmul.f32 %v729_v54, %v2902_v12  ;;  %v783_v35 = vsel %vm740_vm3, %v738_v53, 0.0  ;;  %v1182_v60 = vmul.f32 %v3156_v1, %v768_v2 }
 0x311   :  { %v761_v30 = vadd.f32 %v760_v46, %v759_v56  ;;  %v784_v33 = vrot.slane %v783_v35, 4  ;;  %v731_v22 = vmul.f32 %v2372_v27, %v3103_v62  ;;  %1197 = vrot.lane.b32.xlu1 %v1180_v15, %s2680_s7  ;;  %v3188_v56 = vpop.permute.xlu1 %1156  ;;  %v201_v53 = vmax.f32 %v2841_v29, 0.0  ;;  %v2441_v29 = vld [vmem:[#allocation3] sm:$0xff] }
 0x312   :  { %v773_v61 = vadd.f32 %v772_v51, %v771_v4  ;;  %v776_v37 = vsel %vm740_vm3, %v737_v28, 0.0 }
 0x313   :  { %v1181_v47 = vmul.f32 %v3145_v19, %v761_v30  ;;  %v777_v48 = vrot.slane %v776_v37, 4  ;;  %v785_v16 = vadd.f32 %v784_v33, %v783_v35  ;;  %v739_v12 = vmul.f32 %v731_v22, %v2893_v6  ;;  %v1057_v22 = vpop.permute.xlu0 %1056 }
 0x314   :  { %v774_v34 = vrot.slane %v773_v61, 1  ;;  %v1498_v51 = vpack.c.bf16 %v201_v53, %v201_v53  ;;  %v1009_v33 = vrot.slane %v2441_v29, %v2836_v26 }
 0x315   :  { %v778_v58 = vadd.f32 %v777_v48, %v776_v37  ;;  %v786_v49 = vrot.slane %v785_v16, 2  ;;  %v790_v62 = vsel %vm740_vm3, %v739_v12, 0.0  ;;  %1199 = vrot.lane.b32.xlu0 %v1181_v47, %s2680_s7  ;;  %1201 = vrot.lane.b32.xlu1 %v1182_v60, %s2680_s7  ;;  %v3194_v27 = vpop.permute.xlu1 %1160  ;;  %v1002_v12 = vcombine.high %v2441_v29, %v2441_v29  ;;  %v2445_v29 = vld [vmem:[#allocation6 + $0x18] sm:$0xff] }
 0x316   :  { %v775_v41 = vadd.f32 %v774_v34, %v773_v61  ;;  %v791_v3 = vrot.slane %v790_v62, 4  ;;  %v1017_v60 = vcombine.high %v1009_v33, %v1009_v33  ;;  %v1025_v61 = vrot.slane %v1009_v33, %v2836_v26 }
 0x317   :  { %v779_v57 = vrot.slane %v778_v58, 2  ;;  %v787_v23 = vadd.f32 %v786_v49, %v785_v16  ;;  %v1069_v47 = vpop.permute.xlu0 %1068  ;;  %v1166_v33 = vmul.f32 %v2445_v29, %v3156_v1 }
 0x318   :  { %v1183_v6 = vmul.f32 %v3168_v25, %v775_v41  ;;  %v792_v13 = vadd.f32 %v791_v3, %v790_v62  ;;  %v1039_v48 = vrot.slane %v1017_v60, %v2836_v26  ;;  %v1086_v16 = vrot.slane %v1025_v61, %v2850_v36 }
 0x319   :  { %v780_v9 = vadd.f32 %v779_v57, %v778_v58  ;;  %v788_v10 = vrot.slane %v787_v23, 1  ;;  %v1053_v35 = vpop.permute.xlu1 %1052  ;;  %v1047_v62 = vcombine.high %v1025_v61, %v1025_v61  ;;  %v1163_v57 = vmul.f32 %v2442_v5, %v3159_v63 }
 0x31a   :  { %v793_v11 = vrot.slane %v792_v13, 2  ;;  %1203 = vrot.lane.b32.xlu0 %v1183_v6, %s2680_s7  ;;  %v1090_v58 = vrot.slane %v1039_v48, %v2850_v36  ;;  %v1123_v49 = vmul.f32 %v1086_v16, %v1053_v35  ;;  %v1049_v41 = vcombine.high %v1039_v48, %v1039_v48 }
 0x31b   :  { %v781_v14 = vrot.slane %v780_v9, 1  ;;  %v789_v52 = vadd.f32 %v788_v10, %v787_v23  ;;  %v1077_v3 = vpop.permute.xlu0 %1076  ;;  %v1016_v23 = vrot.slane %v1002_v12, %v2836_v26 }
 0x31c   :  { %v794_v2 = vadd.f32 %v793_v11, %v792_v13  ;;  %v1124_v6 = vmul.f32 %v1090_v58, %v1057_v22  ;;  %v1094_v13 = vrot.slane %v1047_v62, %v2850_v36  ;;  %v1171_v10 = vsub.f32 %v1123_v49, %v1163_v57 }
 0x31d   :  { %v782_v4 = vadd.f32 %v781_v14, %v780_v9  ;;  %v1185_v54 = vmul.f32 %v3188_v56, %v789_v52  ;;  %v1061_v30 = vpop.permute.xlu1 %1060  ;;  %v1098_v9 = vrot.slane %v1049_v41, %v2850_v36  ;;  %v2443_v52 = vld [vmem:[#allocation6 + $0x8] sm:$0xff]  ;;  %v1018_v53 = vcombine.high %v1016_v23, %v1016_v23 }
 0x31e   :  { %v795_v8 = vrot.slane %v794_v2, 1 }
 0x31f   :  { %v1184_v15 = vmul.f32 %v3178_v55, %v782_v4  ;;  %1207 = vrot.lane.b32.xlu0 %v1185_v54, %s2680_s7  ;;  %v1032_v54 = vrot.slane %v1016_v23, %v2836_v26 }
 0x320   :  { %v796_v46 = vadd.f32 %v795_v8, %v794_v2  ;;  %v1164_v2 = vmul.f32 %v2443_v52, %v3130_v21  ;;  %v1125_v8 = vmul.f32 %v1094_v13, %v1061_v30  ;;  %v1046_v30 = vrot.slane %v1018_v53, %v2836_v26  ;;  %v2447_v13 = vld [vmem:[#allocation6 + $0x30] sm:$0xff] }
 0x321   :  { %1205 = vrot.lane.b32.xlu1 %v1184_v15, %s2680_s7  ;;  %v1065_v37 = vpop.permute.xlu1 %1064  ;;  %v1102_v60 = vrot.slane %v1032_v54, %v2850_v36  ;;  %v1048_v61 = vcombine.high %v1032_v54, %v1032_v54  ;;  %v2448_v54 = vld [vmem:[#allocation6 + $0x28] sm:$0xff] }
 0x322   :  { %v1186_v28 = vmul.f32 %v3194_v27, %v796_v46  ;;  %v1126_v15 = vmul.f32 %v1098_v9, %v1065_v37  ;;  %v1172_v46 = vsub.f32 %v1124_v6, %v1164_v2  ;;  %v1050_v57 = vcombine.high %v1046_v30, %v1046_v30 }
 0x323   :  { %1509 = vrot.lane.b32.xlu0 %v1498_v51, %s2667_s26  ;;  %v1127_v41 = vmul.f32 %v1102_v60, %v1069_v47  ;;  %v1110_v5 = vrot.slane %v1048_v61, %v2850_v36  ;;  %v1169_v9 = vmul.f32 %v2447_v13, %v3188_v56  ;;  %v1168_v53 = vmul.f32 %v2448_v54, %v3178_v55 }
 0x324   :  { %v1174_v48 = vsub.f32 %v1126_v15, %v1166_v33 }
 0x325   :  { %1209 = vrot.lane.b32.xlu1 %v1186_v28, %s2680_s7  ;;  %v3204_v34 = vpop.permute.xlu1 %1072  ;;  %v2444_v28 = vld [vmem:[#allocation6 + $0x10] sm:$0xff]  ;;  %v1129_v2 = vmul.f32 %v1110_v5, %v1077_v3 }
 0x326   :  { %v1165_v35 = vmul.f32 %v2444_v28, %v3145_v19  ;;  %v2446_v19 = vld [vmem:[#allocation6 + $0x20] sm:$0xff]  ;;  %v2449_v28 = vld [vmem:[#allocation6 + $0x38] sm:$0xff] }
 0x327   :  { %v1167_v16 = vmul.f32 %v2446_v19, %v3168_v25 }
 0x328   :  { %v1173_v37 = vsub.f32 %v1125_v8, %v1165_v35  ;;  %v1177_v8 = vsub.f32 %v1129_v2, %v1169_v9  ;;  %v1170_v35 = vmul.f32 %v2449_v28, %v3194_v27 }
 0x329   :  { %v1081_v11 = vpop.permute.xlu1 %1080  ;;  %v1175_v6 = vsub.f32 %v1127_v41, %v1167_v16 }
 0x37e   :  { %v1196_v14 = vpop.permute.xlu0 %1195 }
 0x37f   :  { %v1219_v4 = vadd.f32 %v1196_v14, %v1171_v10 }
 0x381   :  { %v3214_v63 = vmul.f32 %v3093_v17, %v1219_v4  ;;  %v1114_v4 = vrot.slane %v1050_v57, %v2850_v36 }
 0x383   :  { %v1198_v51 = vpop.permute.xlu1 %1197  ;;  %v1864_v21 = vpack.c.bf16 %v3214_v63, %v3214_v63 }
 0x384   :  { %v1220_v22 = vadd.f32 %v1198_v51, %v1172_v46 }
 0x385   :  { %1873 = vst.msk [vmem:[#allocation12] sm:$0xf] %vm1872_vm2, %v1864_v21 }
 0x386   :  { %v3224_v17 = vmul.f32 %v3112_v18, %v1220_v22  ;;  %v1106_v18 = vrot.slane %v1046_v30, %v2850_v36 }
 0x387   :  { %v1200_v1 = vpop.permute.xlu0 %1199  ;;  %v1202_v12 = vpop.permute.xlu1 %1201 }
 0x388   :  { %v1235_v58 = vpack.c.bf16 %v3224_v17, %v3214_v63  ;;  %v1865_v49 = vpack.c.bf16 %v3224_v17, %v3224_v17  ;;  %v1221_v62 = vadd.f32 %v1200_v1, %v1173_v37  ;;  %v1222_v26 = vadd.f32 %v1202_v12, %v1174_v48  ;;  %v2131_v37 = vld [vmem:[%s3561_s9] ss:$0 sm:$0xff] }
 0x389   :  { %v2146_v12 = vld [vmem:[%s3562_s10] ss:$0 sm:$0xff] }
 0x38a   :  { %1874 = vst.msk [vmem:[#allocation12 + $0x4] sm:$0xf] %vm1872_vm2, %v1865_v49  ;;  %v3235_v25 = vmul.f32 %v3087_v39, %v1221_v62  ;;  %v3238_v23 = vmul.f32 %v3106_v7, %v1222_v26  ;;  %2218 = vmatprep.mubr.msk.bf16.mxu1 %vm157_vm1, %v1235_v58  ;;  %v1128_v7 = vmul.f32 %v1106_v18, %v3204_v34 }
 0x38b   :  { %v1130_v34 = vmul.f32 %v1114_v4, %v1081_v11 }
 0x38c   :  { %v1866_v47 = vpack.c.bf16 %v3235_v25, %v3235_v25  ;;  %v1236_v10 = vpack.c.bf16 %v3238_v23, %v3235_v25  ;;  %v1867_v14 = vpack.c.bf16 %v3238_v23, %v3238_v23  ;;  %v1204_v39 = vpop.permute.xlu0 %1203  ;;  %v1176_v36 = vsub.f32 %v1128_v7, %v1168_v53 }
 0x38d   :  { %v1223_v52 = vadd.f32 %v1204_v39, %v1175_v6  ;;  %v1178_v11 = vsub.f32 %v1130_v34, %v1170_v35 }
 0x38e   :  { %1875 = vst.msk [vmem:[#allocation12 + $0x8] sm:$0xf] %vm1872_vm2, %v1866_v47  ;;  %1876 = vst.msk [vmem:[#allocation12 + $0xc] sm:$0xf] %vm1872_vm2, %v1867_v14  ;;  %2219 = vmatmul.mubr.msk.bf16.vlgmr.msra.gmra.mxu1 %vm157_vm1, %v1236_v10 }
 0x38f   :  { %v3254_v56 = vmul.f32 %v3121_v32, %v1223_v52 }
 0x391   :  { %v1868_v3 = vpack.c.bf16 %v3254_v56, %v3254_v56  ;;  %v1208_v15 = vpop.permute.xlu0 %1207 }
 0x392   :  { %v1225_v46 = vadd.f32 %v1208_v15, %v1177_v8 }
 0x393   :  { %1877 = vst.msk [vmem:[#allocation12 + $0x10] sm:$0xf] %vm1872_vm2, %v1868_v3  ;;  %v1206_v51 = vpop.permute.xlu1 %1205 }
 0x394   :  { %v3262_v32 = vmul.f32 %v3118_v59, %v1225_v46  ;;  %v1224_v29 = vadd.f32 %v1206_v51, %v1176_v36 }
 0x395   :  { %v1510_v55 = vpop.permute.xlu0 %1509 }
 0x396   :  { %v1870_v33 = vpack.c.bf16 %v3262_v32, %v3262_v32  ;;  %v3267_v21 = vmul.f32 %v3148_v20, %v1224_v29  ;;  %2229 = vmatmul.mubr.msk.bf16.vlgmr.msra.gmra.mxu0 %vm1410_vm4, %v1510_v55 }
 0x397   :  { %v1210_v22 = vpop.permute.xlu1 %1209 }
 0x398   :  { %1879 = vst.msk [vmem:[#allocation12 + $0x18] sm:$0xf] %vm1872_vm2, %v1870_v33  ;;  %v1237_v27 = vpack.c.bf16 %v3267_v21, %v3254_v56  ;;  %v1869_v59 = vpack.c.bf16 %v3267_v21, %v3267_v21  ;;  %v1226_v60 = vadd.f32 %v1210_v22, %v1178_v11  ;;  %v2156_v22 = vld [vmem:[%s3565_s13] ss:$0 sm:$0xff]  ;;  %s2681_s13 = smov 29  }
 0x39a   :  { %1878 = vst.msk [vmem:[#allocation12 + $0x14] sm:$0xf] %vm1872_vm2, %v1869_v59  ;;  %v3277_v61 = vmul.f32 %v3135_v0, %v1226_v60  ;;  %2222 = vmatprep.mubr.msk.bf16.mxu1 %vm157_vm1, %v1237_v27 }
 0x39c   :  { %v1238_v20 = vpack.c.bf16 %v3277_v61, %v3262_v32  ;;  %v1871_v30 = vpack.c.bf16 %v3277_v61, %v3277_v61 }
 0x39e   :  { %1880 = vst.msk [vmem:[#allocation12 + $0x1c] sm:$0xf] %vm1872_vm2, %v1871_v30  ;;  %2223 = vmatmul.mubr.msk.bf16.gmra.mxu1 %vm157_vm1, %v1238_v20 }
 0x44e   :  { %v2220_v48 = vpop.f32.mrf.mxu1 }
 0x44f   :  { %v1317_v19 = vadd.f32 %v2220_v48, %v2131_v37 }
 0x450   :  { %v1308_v0 = vpop.f32.mrf.mxu1 }
 0x451   :  { %v1341_v16 = vmax.f32 %v1317_v19, 0.0  ;;  %v1309_v1 = vadd.f32 %v2131_v37, %v1308_v0  ;;  %v2140_v0 = vmul.f32 -1.442695, %v1317_v19 }
 0x452   :  { %v2221_v58 = vpop.f32.mrf.mxu1 }
 0x453   :  { %v1339_v49 = vmax.f32 %v1309_v1, 0.0  ;;  %v3292_v62 = vadd.f32 %v2221_v58, %v2131_v37  ;;  %v1404_v41 = vmul.f32 %v2146_v12, %v1341_v16  ;;  %2373 = vpow2.f32 %v2140_v0 }
 0x454   :  { %v1311_v26 = vpop.f32.mrf.mxu1  ;;  %v2138_v16 = vmul.f32 -1.442695, %v1309_v1 }
 0x455   :  { %v1342_v5 = vmax.f32 %v3292_v62, 0.0  ;;  %v3295_v18 = vadd.f32 %v2131_v37, %v1311_v26  ;;  %v1417_v6 = vsel %vm1410_vm4, %v1404_v41, 0.0  ;;  %v1402_v13 = vmul.f32 %v2146_v12, %v1339_v49 }
 0x456   :  { %v1554_v57 = vpop.f32.mrf.mxu0  ;;  %1418 = vadd.xlane.f32.xlu0 %v1417_v6  ;;  %2375 = vpow2.f32 %v2138_v16 }
 0x457   :  { %v1340_v9 = vmax.f32 %v3295_v18, 0.0  ;;  %v1411_v10 = vsel %vm1410_vm4, %v1402_v13, 0.0  ;;  %v1405_v14 = vmul.f32 %v2146_v12, %v1342_v5  ;;  %v3319_v20 = vadd.f32 %v2156_v22, %v1554_v57 }
 0x458   :  { %v2230_v47 = vpop.f32.mrf.mxu0  ;;  %1412 = vadd.xlane.f32.xlu1 %v1411_v10 }
 0x459   :  { %v1403_v39 = vmul.f32 %v2146_v12, %v1340_v9  ;;  %v1420_v4 = vsel %vm1410_vm4, %v1405_v14, 0.0  ;;  %v1561_v48 = vsel %vm1560_vm5, %v3319_v20, -inf }
 0x45a   :  { %v1557_v52 = vpop.f32.mrf.mxu0 }
 0x45b   :  { %v1414_v2 = vsel %vm1410_vm4, %v1403_v39, 0.0 }
 0x45c   :  { %v2231_v7 = vpop.f32.mrf.mxu0  ;;  %1415 = vadd.xlane.f32.xlu0 %v1414_v2  ;;  %1421 = vadd.xlane.f32.xlu1 %v1420_v4 }
 0x45e   :  { %v2224_v54 = vpop.f32.mrf.mxu1 }
 0x45f   :  { %v3302_v53 = vadd.f32 %v2224_v54, %v2131_v37 }
 0x460   :  { %v1324_v8 = vpop.f32.mrf.mxu1  ;;  %v2374_v58 = vpop.eup %2373 }
 0x461   :  { %v3304_v3 = vadd.f32 %v2131_v37, %v1324_v8  ;;  %v1345_v46 = vmax.f32 %v3302_v53, 0.0 }
 0x462   :  { %v2225_v15 = vpop.f32.mrf.mxu1 }
 0x463   :  { %v1343_v34 = vmax.f32 %v3304_v3, 0.0  ;;  %v3308_v36 = vadd.f32 %v2225_v15, %v2131_v37  ;;  %v1408_v11 = vmul.f32 %v2146_v12, %v1345_v46  ;;  %v2376_v49 = vpop.eup %2375  ;;  %v2142_v16 = vmul.f32 -1.442695, %v3304_v3 }
 0x464   :  { %v1327_v51 = vpop.f32.mrf.mxu1  ;;  %v1371_v26 = vadd.f32 1.0, %v2376_v49  ;;  %v2141_v3 = vmul.f32 -1.442695, %v3292_v62 }
 0x465   :  { %v3310_v28 = vadd.f32 %v2131_v37, %v1327_v51  ;;  %v1406_v35 = vmul.f32 %v2146_v12, %v1343_v34  ;;  %v1346_v29 = vmax.f32 %v3308_v36, 0.0  ;;  %v1429_v30 = vsel %vm1410_vm4, %v1408_v11, 0.0 }
 0x467   :  { %v1344_v55 = vmax.f32 %v3310_v28, 0.0  ;;  %v1423_v33 = vsel %vm1410_vm4, %v1406_v35, 0.0  ;;  %v1409_v60 = vmul.f32 %v2146_v12, %v1346_v29 }
 0x468   :  { %1424 = vadd.xlane.f32.xlu0 %v1423_v33 }
 0x469   :  { %v1407_v27 = vmul.f32 %v2146_v12, %v1344_v55  ;;  %v1432_v37 = vsel %vm1410_vm4, %v1409_v60, 0.0  ;;  %v1373_v12 = vadd.f32 1.0, %v2374_v58 }
 0x46b   :  { %v1426_v59 = vsel %vm1410_vm4, %v1407_v27, 0.0  ;;  %2377 = vrcp.f32 %v1373_v12  ;;  %v2144_v12 = vmul.f32 -1.442695, %v3302_v53 }
 0x46c   :  { %1427 = vadd.xlane.f32.xlu1 %v1426_v59  ;;  %1430 = vadd.xlane.f32.xlu0 %v1429_v30  ;;  %2379 = vrcp.f32 %v1371_v26 }
 0x470   :  { %1433 = vadd.xlane.f32.xlu1 %v1432_v37  ;;  %1562 = vmax.xlane.f32.xlu0 %v1561_v48 }
 0x478   :  { %v2378_v19 = vpop.eup %2377 }
 0x479   :  { %v2380_v1 = vpop.eup %2379 }
 0x486   :  { %1897 = vrot.lane.b32.xlu0 %v2929_v40, %s2681_s13  ;;  %v2683_v40 = vmov 0  }
 0x487   :  { %2267 = vset.pattern.permute.xlu0 %v2683_v40  ;;  %2266 = vset.pattern.permute.xlu1 %v2683_v40 }
 0x48a   :  { %1901 = vrot.lane.b32.xlu0 %v2919_v31, %s2681_s13  ;;  %v2147_v31 = vld [vmem:[#allocation2] ss:$0 sm:$0xff] }
 0x48e   :  { %1905 = vrot.lane.b32.xlu0 %v2947_v44, %s2681_s13 }
 0x492   :  { %1909 = vrot.lane.b32.xlu0 %v2941_v43, %s2681_s13 }
 0x496   :  { %1933 = vrot.lane.b32.xlu0 %v2378_v19, %s2682_s29 }
 0x49a   :  { %1929 = vrot.lane.b32.xlu0 %v2380_v1, %s2682_s29 }
 0x4df   :  { %v1419_v41 = vpop.xlane.xlu0 %1418 }
 0x4e0   :  { %v1444_v5 = vadd.f32 %v2147_v31, %v1419_v41 }
 0x4e1   :  { %v1413_v57 = vpop.xlane.xlu1 %1412 }
 0x4e2   :  { %v2150_v44 = vmul.f32 -1.442695, %v1444_v5  ;;  %v1442_v6 = vadd.f32 %v2147_v31, %v1413_v57 }
 0x4e4   :  { %2381 = vpow2.f32 %v2150_v44  ;;  %v2148_v43 = vmul.f32 -1.442695, %v1442_v6 }
 0x4e5   :  { %v1416_v13 = vpop.xlane.xlu0 %1415  ;;  %v1422_v47 = vpop.xlane.xlu1 %1421 }
 0x4e6   :  { %v1443_v9 = vadd.f32 %v2147_v31, %v1416_v13  ;;  %2383 = vpow2.f32 %v2148_v43  ;;  %v1445_v10 = vadd.f32 %v2147_v31, %v1422_v47 }
 0x4e8   :  { %v2149_v14 = vmul.f32 -1.442695, %v1443_v9  ;;  %v2151_v39 = vmul.f32 -1.442695, %v1445_v10 }
 0x4ea   :  { %2385 = vpow2.f32 %v2149_v14 }
 0x4eb   :  { %2387 = vpow2.f32 %v2151_v39 }
 0x4f1   :  { %v2382_v52 = vpop.eup %2381  ;;  %v1425_v2 = vpop.xlane.xlu0 %1424 }
 0x4f2   :  { %v1476_v7 = vadd.f32 1.0, %v2382_v52  ;;  %v1446_v4 = vadd.f32 %v2147_v31, %v1425_v2 }
 0x4f3   :  { %v2384_v54 = vpop.eup %2383 }
 0x4f4   :  { %2389 = vrcp.f32 %v1476_v7  ;;  %v1474_v8 = vadd.f32 1.0, %v2384_v54  ;;  %v2152_v15 = vmul.f32 -1.442695, %v1446_v4 }
 0x4f5   :  { %v1428_v34 = vpop.xlane.xlu1 %1427  ;;  %v1431_v46 = vpop.xlane.xlu0 %1430 }
 0x4f6   :  { %v1447_v51 = vadd.f32 %v2147_v31, %v1428_v34  ;;  %2391 = vrcp.f32 %v1474_v8  ;;  %v1448_v29 = vadd.f32 %v2147_v31, %v1431_v46  ;;  %v2139_v34 = vmul.f32 -1.442695, %v3295_v18 }
 0x4f7   :  { %v2386_v35 = vpop.eup %2385  ;;  %2393 = vpow2.f32 %v2152_v15 }
 0x4f8   :  { %v2388_v55 = vpop.eup %2387  ;;  %v1475_v33 = vadd.f32 1.0, %v2386_v35  ;;  %v2154_v22 = vmul.f32 -1.442695, %v1448_v29  ;;  %v2153_v27 = vmul.f32 -1.442695, %v1447_v51 }
 0x4f9   :  { %v1477_v11 = vadd.f32 1.0, %v2388_v55  ;;  %v1434_v59 = vpop.xlane.xlu1 %1433  ;;  %v1563_v60 = vpop.xlane.xlu0 %1562 }
 0x4fa   :  { %2395 = vrcp.f32 %v1475_v33  ;;  %v1449_v30 = vadd.f32 %v2147_v31, %v1434_v59  ;;  %v1564_v37 = vsub.f32 %v3319_v20, %v1563_v60 }
 0x4fb   :  { %2397 = vrcp.f32 %v1477_v11 }
 0x4fc   :  { %2399 = vpow2.f32 %v2154_v22  ;;  %v2155_v48 = vmul.f32 -1.442695, %v1449_v30  ;;  %v1565_v0 = vmul.f32 1.442695, %v1564_v37 }
 0x4fd   :  { %2401 = vpow2.f32 %v2153_v27 }
 0x4fe   :  { %2403 = vpow2.f32 %v2155_v48 }
 0x4ff   :  { %2405 = vpow2.f32 %v1565_v0 }
 0x500   :  { %2407 = vpow2.f32 %v2142_v16 }
 0x501   :  { %v3339_v58 = vpop.eup %2389  ;;  %2409 = vpow2.f32 %v2144_v12 }
 0x502   :  { %v1590_v49 = vsel %vm1575_vm6, %v3339_v58, -inf }
 0x503   :  { %v3344_v26 = vpop.eup %2391  ;;  %v1591_v19 = vrot.slane %v1590_v49, 4 }
 0x504   :  { %v2394_v20 = vpop.eup %2393  ;;  %v1576_v1 = vsel %vm1575_vm6, %v3344_v26, -inf }
 0x505   :  { %v1478_v31 = vadd.f32 1.0, %v2394_v20  ;;  %v1577_v41 = vrot.slane %v1576_v1, 4  ;;  %v1592_v5 = vmax.f32 %v1590_v49, %v1591_v19 }
 0x507   :  { %v3348_v57 = vpop.eup %2395  ;;  %2411 = vrcp.f32 %v1478_v31  ;;  %v1578_v44 = vmax.f32 %v1576_v1, %v1577_v41  ;;  %v1593_v6 = vrot.slane %v1592_v5, 2 }
 0x508   :  { %v3351_v53 = vpop.eup %2397  ;;  %v1583_v43 = vsel %vm1575_vm6, %v3348_v57, -inf  ;;  %2413 = vpow2.f32 %v2141_v3 }
 0x509   :  { %v2400_v13 = vpop.eup %2399  ;;  %v1597_v9 = vsel %vm1575_vm6, %v3351_v53, -inf  ;;  %v1584_v47 = vrot.slane %v1583_v43, 4  ;;  %v1579_v39 = vrot.slane %v1578_v44, 2  ;;  %v1594_v52 = vmax.f32 %v1592_v5, %v1593_v6 }
 0x50a   :  { %v2402_v10 = vpop.eup %2401  ;;  %v1480_v14 = vadd.f32 1.0, %v2400_v13  ;;  %v1598_v2 = vrot.slane %v1597_v9, 4 }
 0x50b   :  { %v2404_v62 = vpop.eup %2403  ;;  %v1585_v7 = vmax.f32 %v1583_v43, %v1584_v47  ;;  %v1580_v8 = vmax.f32 %v1578_v44, %v1579_v39  ;;  %v1595_v15 = vrot.slane %v1594_v52, 1  ;;  %v1479_v33 = vadd.f32 1.0, %v2402_v10 }
 0x50c   :  { %v3357_v4 = vpop.eup %2405  ;;  %2415 = vrcp.f32 %v1480_v14  ;;  %v1481_v54 = vadd.f32 1.0, %v2404_v62  ;;  %v1599_v51 = vmax.f32 %v1597_v9, %v1598_v2 }
 0x50d   :  { %v1567_v46 = vsel %vm1560_vm5, %v3357_v4, 0.0  ;;  %v1586_v35 = vrot.slane %v1585_v7, 2  ;;  %v1581_v29 = vrot.slane %v1580_v8, 1  ;;  %v1596_v55 = vmax.f32 %v1594_v52, %v1595_v15  ;;  %v2408_v30 = vpop.eup %2407 }
 0x50e   :  { %1568 = vadd.xlane.f32.xlu1 %v1567_v46  ;;  %2417 = vrcp.f32 %v1481_v54  ;;  %v1600_v11 = vrot.slane %v1599_v51, 2  ;;  %v2410_v12 = vpop.eup %2409  ;;  %v1375_v1 = vadd.f32 1.0, %v2408_v30 }
 0x50f   :  { %v1587_v22 = vmax.f32 %v1585_v7, %v1586_v35  ;;  %v1582_v27 = vmax.f32 %v1580_v8, %v1581_v29  ;;  %vm1634_vm7 = vcmp.eq.f32.partialorder %v3339_v58, %v1596_v55  ;;  %2419 = vpow2.f32 %v2139_v34 }
 0x510   :  { %v1642_v59 = vsel %vm1634_vm7, %v2830_v24, 8  ;;  %v1601_v60 = vmax.f32 %v1599_v51, %v1600_v11  ;;  %2421 = vrcp.f32 %v1479_v33  ;;  %v1377_v3 = vadd.f32 1.0, %v2410_v12 }
 0x511   :  { %v1588_v18 = vrot.slane %v1587_v22, 1  ;;  %vm1632_vm8 = vcmp.eq.f32.partialorder %v3344_v26, %v1582_v27  ;;  %v1668_v37 = vsel %vm1575_vm6, %v1642_v59, 2147483647  ;;  %2423 = vrcp.f32 %v1375_v1 }
 0x512   :  { %v1640_v48 = vsel %vm1632_vm8, %v2830_v24, 8  ;;  %v1669_v0 = vrot.slane %v1668_v37, 4  ;;  %v1602_v16 = vrot.slane %v1601_v60, 1  ;;  %2425 = vrcp.f32 %v1377_v3 }
 0x513   :  { %v1648_v49 = vsel %vm1575_vm6, %v1640_v48, 2147483647  ;;  %v1589_v19 = vmax.f32 %v1587_v22, %v1588_v18 }
 0x514   :  { %v3368_v20 = vpop.eup %2411  ;;  %v1649_v31 = vrot.slane %v1648_v49, 4  ;;  %vm1670_vm9 = vcmp.lt.s32.totalorder %v1668_v37, %v1669_v0  ;;  %v1603_v41 = vmax.f32 %v1601_v60, %v1602_v16 }
 0x515   :  { %vm1633_vm10 = vcmp.eq.f32.partialorder %v3348_v57, %v1589_v19  ;;  %v1604_v5 = vsel %vm1575_vm6, %v3368_v20, -inf  ;;  %v2414_v6 = vpop.eup %2413  ;;  %v1671_v13 = vsel %vm1670_vm9, %v1668_v37, %v1669_v0 }
 0x516   :  { %vm1650_vm11 = vcmp.lt.s32.totalorder %v1648_v49, %v1649_v31  ;;  %vm1635_vm12 = vcmp.eq.f32.partialorder %v3351_v53, %v1603_v41  ;;  %v1641_v44 = vsel %vm1633_vm10, %v2830_v24, 8  ;;  %v1605_v47 = vrot.slane %v1604_v5, 4 }
 0x517   :  { %v1651_v43 = vsel %vm1650_vm11, %v1648_v49, %v1649_v31  ;;  %v1643_v9 = vsel %vm1635_vm12, %v2830_v24, 8  ;;  %v1658_v52 = vsel %vm1575_vm6, %v1641_v44, 2147483647  ;;  %v1672_v54 = vrot.slane %v1671_v13, 2 }
 0x518   :  { %v1652_v14 = vrot.slane %v1651_v43, 2  ;;  %v1678_v39 = vsel %vm1575_vm6, %v1643_v9, 2147483647  ;;  %v1606_v7 = vmax.f32 %v1604_v5, %v1605_v47  ;;  %v1659_v46 = vrot.slane %v1658_v52, 4 }
 0x519   :  { %v3376_v10 = vpop.eup %2415  ;;  %v1679_v2 = vrot.slane %v1678_v39, 4  ;;  %v1374_v35 = vadd.f32 1.0, %v2414_v6  ;;  %vm1673_vm0 = vcmp.lt.s32.totalorder %v1671_v13, %v1672_v54 }
 0x51a   :  { %v1618_v62 = vsel %vm1575_vm6, %v3376_v10, -inf  ;;  %vm1653_vm13 = vcmp.lt.s32.totalorder %v1651_v43, %v1652_v14  ;;  %v1607_v51 = vrot.slane %v1606_v7, 2  ;;  %vm1660_vm2 = vcmp.lt.s32.totalorder %v1658_v52, %v1659_v46 }
 0x51b   :  { %v1619_v8 = vrot.slane %v1618_v62, 4  ;;  %v3382_v15 = vpop.eup %2417  ;;  %v1654_v34 = vsel %vm1653_vm13, %v1651_v43, %v1652_v14  ;;  %vm1680_vm14 = vcmp.lt.s32.totalorder %v1678_v39, %v1679_v2  ;;  %2427 = vrcp.f32 %v1374_v35 }
 0x51c   :  { %v1655_v29 = vrot.slane %v1654_v34, 1  ;;  %v2420_v55 = vpop.eup %2419  ;;  %v1608_v11 = vmax.f32 %v1606_v7, %v1607_v51  ;;  %v1625_v22 = vsel %vm1575_vm6, %v3382_v15, -inf  ;;  %v1681_v60 = vsel %vm1680_vm14, %v1678_v39, %v1679_v2 }
 0x51d   :  { %v1620_v33 = vmax.f32 %v1618_v62, %v1619_v8  ;;  %v3388_v27 = vpop.eup %2421  ;;  %v1372_v18 = vadd.f32 1.0, %v2420_v55  ;;  %v1674_v48 = vsel %vm1673_vm0, %v1671_v13, %v1672_v54  ;;  %v1682_v16 = vrot.slane %v1681_v60, 2 }
 0x51e   :  { %vm1656_vm15 = vcmp.lt.s32.totalorder %v1654_v34, %v1655_v29  ;;  %v1609_v0 = vrot.slane %v1608_v11, 1  ;;  %v1661_v12 = vsel %vm1660_vm2, %v1658_v52, %v1659_v46  ;;  %v1611_v19 = vsel %vm1575_vm6, %v3388_v27, -inf  ;;  %v2424_v3 = vpop.eup %2423 }
 0x51f   :  { %1899 = vrot.lane.b32.xlu1 %v2935_v42, %s2681_s13  ;;  %v1657_v59 = vsel %vm1656_vm15, %v1654_v34, %v1655_v29  ;;  %v1621_v30 = vrot.slane %v1620_v33, 2  ;;  %v1626_v42 = vrot.slane %v1625_v22, 4  ;;  %2429 = vrcp.f32 %v1372_v18  ;;  %v2426_v2 = vpop.eup %2425 }
 0x520   :  { %vm1728_vm3 = vcmp.eq.s32.totalorder %v2830_v24, %v1657_v59  ;;  %v1610_v1 = vmax.f32 %v1608_v11, %v1609_v0  ;;  %v1612_v5 = vrot.slane %v1611_v19, 4  ;;  %v1675_v44 = vrot.slane %v1674_v48, 1 }
 0x521   :  { %v1736_v37 = vsel %vm1728_vm3, 1, %v2683_v40  ;;  %v1622_v49 = vmax.f32 %v1620_v33, %v1621_v30  ;;  %v1627_v31 = vmax.f32 %v1625_v22, %v1626_v42  ;;  %v1662_v6 = vrot.slane %v1661_v12, 2 }
 0x522   :  { %1745 = vperm.xlu0 %2267, %v1736_v37   ;;  %vm1636_vm4 = vcmp.eq.f32.partialorder %v3368_v20, %v1610_v1  ;;  %vm1683_vm7 = vcmp.lt.s32.totalorder %v1681_v60, %v1682_v16  ;;  %v1613_v9 = vmax.f32 %v1611_v19, %v1612_v5  ;;  %vm3403_vm9 = vcmp.lt.s32.totalorder %v1674_v48, %v1675_v44 }
 0x523   :  { %1903 = vrot.lane.b32.xlu1 %v2923_v38, %s2681_s13  ;;  %v1623_v41 = vrot.slane %v1622_v49, 1  ;;  %v1628_v43 = vrot.slane %v1627_v31, 2  ;;  %v1644_v13 = vsel %vm1636_vm4, %v2830_v24, 8  ;;  %vm1663_vm10 = vcmp.lt.s32.totalorder %v1661_v12, %v1662_v6 }
 0x524   :  { %v1688_v47 = vsel %vm1575_vm6, %v1644_v13, 2147483647  ;;  %v1614_v52 = vrot.slane %v1613_v9, 2  ;;  %v2143_v46 = vmul.f32 -1.442695, %v3310_v28  ;;  %v1677_v22 = vsel %vm3403_vm9, %v1674_v48, %v1675_v44 }
 0x525   :  { %v1624_v38 = vmax.f32 %v1622_v49, %v1623_v41  ;;  %v1629_v14 = vmax.f32 %v1627_v31, %v1628_v43  ;;  %v1689_v39 = vrot.slane %v1688_v47, 4  ;;  %v1664_v59 = vsel %vm1663_vm10, %v1661_v12, %v1662_v6 }
 0x526   :  { %1937 = vrot.lane.b32.xlu0 %v2424_v3, %s2682_s29  ;;  %v1615_v34 = vmax.f32 %v1613_v9, %v1614_v52  ;;  %v2145_v30 = vmul.f32 -1.442695, %v3308_v36  ;;  %2431 = vpow2.f32 %v2143_v46  ;;  %v1665_v0 = vrot.slane %v1664_v59, 1 }
 0x527   :  { %1907 = vrot.lane.b32.xlu1 %v2955_v50, %s2681_s13  ;;  %vm1638_vm8 = vcmp.eq.f32.partialorder %v3376_v10, %v1624_v38  ;;  %v1684_v50 = vsel %vm1683_vm7, %v1681_v60, %v1682_v16  ;;  %v1630_v54 = vrot.slane %v1629_v14, 1  ;;  %vm1690_vm11 = vcmp.lt.s32.totalorder %v1688_v47, %v1689_v39 }
 0x528   :  { %v1646_v7 = vsel %vm1638_vm8, %v2830_v24, 8  ;;  %v1691_v35 = vsel %vm1690_vm11, %v1688_v47, %v1689_v39  ;;  %v1685_v55 = vrot.slane %v1684_v50, 1  ;;  %v1616_v33 = vrot.slane %v1615_v34, 1  ;;  %v2428_v11 = vpop.eup %2427 }
 0x529   :  { %v1708_v8 = vsel %vm1575_vm6, %v1646_v7, 2147483647  ;;  %v1631_v29 = vmax.f32 %v1629_v14, %v1630_v54  ;;  %v1692_v28 = vrot.slane %v1691_v35, 2  ;;  %vm1730_vm0 = vcmp.eq.s32.totalorder %v2830_v24, %v1677_v22 }
 0x52a   :  { %1941 = vrot.lane.b32.xlu0 %v2426_v2, %s2682_s29  ;;  %v1709_v51 = vrot.slane %v1708_v8, 4  ;;  %v1617_v18 = vmax.f32 %v1615_v34, %v1616_v33  ;;  %vm1686_vm14 = vcmp.lt.s32.totalorder %v1684_v50, %v1685_v55  ;;  %2433 = vpow2.f32 %v2145_v30 }
 0x52b   :  { %1911 = vrot.lane.b32.xlu1 %v2949_v45, %s2681_s13  ;;  %vm1639_vm13 = vcmp.eq.f32.partialorder %v3382_v15, %v1631_v29  ;;  %vm1693_vm3 = vcmp.lt.s32.totalorder %v1691_v35, %v1692_v28  ;;  %v1687_v49 = vsel %vm1686_vm14, %v1684_v50, %v1685_v55  ;;  %vm1666_vm7 = vcmp.lt.s32.totalorder %v1664_v59, %v1665_v0 }
 0x52c   :  { %vm1710_vm12 = vcmp.lt.s32.totalorder %v1708_v8, %v1709_v51  ;;  %v1647_v60 = vsel %vm1639_vm13, %v2830_v24, 8  ;;  %vm1637_vm15 = vcmp.eq.f32.partialorder %v3388_v27, %v1617_v18  ;;  %v2430_v16 = vpop.eup %2429  ;;  %v1738_v5 = vsel %vm1730_vm0, 1, %v2683_v40 }
 0x52d   :  { %v1711_v45 = vsel %vm1710_vm12, %v1708_v8, %v1709_v51  ;;  %v1718_v48 = vsel %vm1575_vm6, %v1647_v60, 2147483647  ;;  %v1694_v3 = vsel %vm1693_vm3, %v1691_v35, %v1692_v28  ;;  %vm1731_vm9 = vcmp.eq.s32.totalorder %v2830_v24, %v1687_v49 }
 0x52e   :  { %1961 = vrot.lane.b32.xlu0 %v3344_v26, %s2684_s30  ;;  %v1712_v37 = vrot.slane %v1711_v45, 2  ;;  %v1719_v42 = vrot.slane %v1718_v48, 4  ;;  %v1645_v26 = vsel %vm1637_vm15, %v2830_v24, 8  ;;  %v1667_v44 = vsel %vm1666_vm7, %v1664_v59, %v1665_v0 }
 0x52f   :  { %1935 = vrot.lane.b32.xlu1 %v2428_v11, %s2682_s29  ;;  %v1698_v12 = vsel %vm1575_vm6, %v1645_v26, 2147483647  ;;  %v1695_v43 = vrot.slane %v1694_v3, 1  ;;  %v1739_v38 = vsel %vm1731_vm9, 1, %v2683_v40  ;;  %vm1729_vm11 = vcmp.eq.s32.totalorder %v2830_v24, %v1667_v44 }
 0x530   :  { %vm1713_vm2 = vcmp.lt.s32.totalorder %v1711_v45, %v1712_v37  ;;  %vm1720_vm4 = vcmp.lt.s32.totalorder %v1718_v48, %v1719_v42  ;;  %v1699_v1 = vrot.slane %v1698_v12, 4  ;;  %v1737_v14 = vsel %vm1729_vm11, 1, %v2683_v40 }
 0x531   :  { %v1714_v36 = vsel %vm1713_vm2, %v1711_v45, %v1712_v37  ;;  %v1721_v19 = vsel %vm1720_vm4, %v1718_v48, %v1719_v42  ;;  %vm1696_vm13 = vcmp.lt.s32.totalorder %v1694_v3, %v1695_v43 }
 0x532   :  { %1965 = vrot.lane.b32.xlu0 %v3339_v58, %s2684_s30  ;;  %v1715_v31 = vrot.slane %v1714_v36, 1  ;;  %v1722_v41 = vrot.slane %v1721_v19, 2  ;;  %vm1700_vm8 = vcmp.lt.s32.totalorder %v1698_v12, %v1699_v1  ;;  %v1697_v52 = vsel %vm1696_vm13, %v1694_v3, %v1695_v43 }
 0x533   :  { %1931 = vrot.lane.b32.xlu1 %v2430_v16, %s2682_s29  ;;  %v1701_v58 = vsel %vm1700_vm8, %v1698_v12, %v1699_v1  ;;  %vm1732_vm0 = vcmp.eq.s32.totalorder %v2830_v24, %v1697_v52 }
 0x534   :  { %vm1723_vm6 = vcmp.lt.s32.totalorder %v1721_v19, %v1722_v41  ;;  %v1702_v6 = vrot.slane %v1701_v58, 2  ;;  %vm1716_vm10 = vcmp.lt.s32.totalorder %v1714_v36, %v1715_v31  ;;  %v1740_v8 = vsel %vm1732_vm0, 1, %v2683_v40 }
 0x535   :  { %v1724_v13 = vsel %vm1723_vm6, %v1721_v19, %v1722_v41  ;;  %v1717_v9 = vsel %vm1716_vm10, %v1714_v36, %v1715_v31 }
 0x536   :  { %1969 = vrot.lane.b32.xlu0 %v3368_v20, %s2684_s30  ;;  %vm1703_vm12 = vcmp.lt.s32.totalorder %v1701_v58, %v1702_v6  ;;  %v2432_v20 = vpop.eup %2431  ;;  %v1725_v47 = vrot.slane %v1724_v13, 1  ;;  %vm1734_vm14 = vcmp.eq.s32.totalorder %v2830_v24, %v1717_v9 }
 0x537   :  { %1751 = vperm.xlu1 %2266, %v1738_v5   ;;  %v1704_v39 = vsel %vm1703_vm12, %v1701_v58, %v1702_v6  ;;  %v1376_v2 = vadd.f32 1.0, %v2432_v20  ;;  %v2434_v50 = vpop.eup %2433 }
 0x538   :  { %vm1726_vm15 = vcmp.lt.s32.totalorder %v1724_v13, %v1725_v47  ;;  %v1705_v62 = vrot.slane %v1704_v39, 1  ;;  %v1378_v54 = vadd.f32 1.0, %v2434_v50 }
 0x539   :  { %v1727_v7 = vsel %vm1726_vm15, %v1724_v13, %v1725_v47  ;;  %2435 = vrcp.f32 %v1376_v2 }
 0x53a   :  { %1973 = vrot.lane.b32.xlu0 %v3376_v10, %s2684_s30  ;;  %v1742_v10 = vsel %vm1734_vm14, 1, %v2683_v40  ;;  %vm1706_vm2 = vcmp.lt.s32.totalorder %v1704_v39, %v1705_v62  ;;  %vm1735_vm3 = vcmp.eq.s32.totalorder %v2830_v24, %v1727_v7  ;;  %2437 = vrcp.f32 %v1378_v54 }
 0x53b   :  { %1754 = vperm.xlu1 %2266, %v1739_v38   ;;  %v1707_v34 = vsel %vm1706_vm2, %v1704_v39, %v1705_v62  ;;  %v1743_v46 = vsel %vm1735_vm3, 1, %v2683_v40 }
 0x53c   :  { %vm1733_vm4 = vcmp.eq.s32.totalorder %v2830_v24, %v1707_v34 }
 0x53d   :  { %v1741_v51 = vsel %vm1733_vm4, 1, %v2683_v40 }
 0x53f   :  { %1748 = vperm.xlu1 %2266, %v1737_v14  }
 0x543   :  { %1763 = vperm.xlu1 %2266, %v1742_v10  }
 0x546   :  { %v2436_v35 = vpop.eup %2435 }
 0x547   :  { %1757 = vperm.xlu1 %2266, %v1740_v8   ;;  %v2438_v29 = vpop.eup %2437 }
 0x54b   :  { %1766 = vperm.xlu1 %2266, %v1743_v46  }
 0x54f   :  { %1760 = vperm.xlu1 %2266, %v1741_v51  }
 0x553   :  { %1939 = vrot.lane.b32.xlu1 %v2436_v35, %s2682_s29 }
 0x557   :  { %1943 = vrot.lane.b32.xlu1 %v2438_v29, %s2682_s29 }
 0x55b   :  { %1963 = vrot.lane.b32.xlu1 %v3348_v57, %s2684_s30 }
 0x55f   :  { %1967 = vrot.lane.b32.xlu1 %v3351_v53, %s2684_s30 }
 0x563   :  { %1971 = vrot.lane.b32.xlu1 %v3388_v27, %s2684_s30 }
 0x567   :  { %1975 = vrot.lane.b32.xlu1 %v3382_v15, %s2684_s30 }
 0x568   :  { %2561 = shalt.err (!%p2558_p1)
}
 0x569   :  { %2043 = dma.vmem_to_hbm [thread:$0]  %s2038_s0, 512, %s3567_s15, [#allocation14], %s2667_s26, %s2667_s26, %s2668_s27  }
 0x56a   :  { %s2686_s22 = smov [#allocation12]  }
 0x56b   :  { %s2025_s3 = sshll.u32 %s2686_s22, 4  ;;  %s2026_s3 = int_to_ptr.vmem [resolvable:$true] %s2025_s3 }
 0x56c   :  { %s2570_s5 = scalar_lea.vmem %s2026_s3, 512  ;;  %p2575_p3 = scmp.lt.s32.totalorder %s2026_s3, %s2026_s3 }
 0x56d   :  { %p2571_p2 = scmp.ne.s32.totalorder %s2026_s3, %s2570_s5  ;;  %p2576_p4 = scmp.lt.s32.totalorder %s2570_s5, %s2570_s5 }
 0x56f   :  { %p2577_p5 = por %p2576_p4, %p2575_p3 }
 0x571   :  { %p2578_p6 = pnand %p2577_p5, %p2571_p2 }
 0x573   :  { %2581 = shalt.err (!%p2578_p6)
}
 0x574   :  { %2031 = dma.vmem_to_hbm [thread:$0]  %s2026_s3, 512, %s3566_s14, [#allocation5], %s2667_s26, %s2667_s26, %s2668_s27   ;;  %v1898_v24 = vpop.permute.xlu0 %1897  ;;  %vm1985_vm7 = vcmask 15360   ;;  %vm2002_vm8 = vcmask 48128  }
 0x575   :  { %s2687_s15 = smov [#allocation16]  }
 0x576   :  { %s2062_s6 = sshll.u32 %s2687_s15, 4  ;;  %s2063_s6 = int_to_ptr.vmem [resolvable:$true] %s2062_s6 }
 0x577   :  { %s2590_s14 = scalar_lea.vmem %s2063_s6, 128  ;;  %p2595_p8 = scmp.lt.s32.totalorder %s2063_s6, %s2063_s6 }
 0x578   :  { %v1902_v40 = vpop.permute.xlu0 %1901  ;;  %p2591_p7 = scmp.ne.s32.totalorder %s2063_s6, %s2590_s14  ;;  %p2596_p9 = scmp.lt.s32.totalorder %s2590_s14, %s2590_s14 }
 0x57a   :  { %p2597_p10 = por %p2596_p9, %p2595_p8 }
 0x57c   :  { %v1906_v57 = vpop.permute.xlu0 %1905  ;;  %p2598_p11 = pnand %p2597_p10, %p2591_p7 }
 0x580   :  { %v1910_v53 = vpop.permute.xlu0 %1909 }
 0x584   :  { %v1934_v15 = vpop.permute.xlu0 %1933 }
 0x588   :  { %v1930_v55 = vpop.permute.xlu0 %1929 }
 0x597   :  { %v1569_v27 = vpop.xlane.xlu1 %1568 }
 0x598   :  { %2439 = vrcp.f32 %v1569_v27 }
 0x59b   :  { %v3470_v33 = vpop.permute.xlu1 %1899 }
 0x59d   :  { %v1746_v11 = vpop.permute.xlu0 %1745 }
 0x59f   :  { %v3472_v22 = vpop.permute.xlu1 %1903 }
 0x5a1   :  { %v1938_v59 = vpop.permute.xlu0 %1937 }
 0x5a3   :  { %v3474_v45 = vpop.permute.xlu1 %1907 }
 0x5a5   :  { %v2440_v28 = vpop.eup %2439  ;;  %v1942_v60 = vpop.permute.xlu0 %1941 }
 0x5a6   :  { %v1571_v18 = vmul.f32 %v2440_v28, %v3357_v4 }
 0x5a7   :  { %v3477_v30 = vpop.permute.xlu1 %1911 }
 0x5a8   :  { %1572 = vst.msk [vmem:[#allocation16] sm:$0xff] %vm1560_vm5, %v1571_v18 }
 0x5a9   :  { %2601 = shalt.err (!%p2598_p11)
}
 0x5aa   :  { %2065 = dma.vmem_to_hbm [thread:$0]  %s2063_s6, 128, %s3569_s17, [#allocation17]   ;;  %v1986_v4 = vsel %vm1985_vm7, %v1898_v24, %v1930_v55  ;;  %vm2011_vm9 = vcmask 64512   ;;  %v1962_v37 = vpop.permute.xlu0 %1961  ;;  %v1988_v16 = vsel %vm1985_vm7, %v1902_v40, %v1934_v15  ;;  %v1990_v19 = vsel %vm1985_vm7, %v1906_v57, %v1938_v59 }
 0x5ab   :  { %v3484_v48 = vpop.permute.xlu1 %1935  ;;  %v1994_v0 = vsel %vm1560_vm5, %v1986_v4, %v1962_v37  ;;  %vm1768_vm6 = vcmp.eq.s32.totalorder %v1746_v11, 1  ;;  %v1992_v3 = vsel %vm1985_vm7, %v1910_v53, %v1942_v60  ;;  %vm1848_vm2 = vcmask 1041409   ;;  %s2688_s17 = smov [#allocation18]  }
 0x5ac   :  { %v2003_v42 = vsel %vm2002_vm8, %v1994_v0, 0.0  ;;  %v1776_v43 = vsel %vm1768_vm6, %v3214_v63, 0.0  ;;  %vm1850_vm3 = vcmask 1042434   ;;  %vm1852_vm4 = vcmask 1043459   ;;  %s2072_s7 = sshll.u32 %s2688_s17, 4  ;;  %s2073_s7 = int_to_ptr.vmem [resolvable:$true] %s2072_s7 }
 0x5ad   :  { %2012 = vst.msk [vmem:[#allocation15] sm:$0xff] %vm2011_vm9, %v2003_v42  ;;  %v1784_v13 = vsel %vm157_vm1, %v1776_v43, 0.0  ;;  %vm1854_vm6 = vcmask 1044484   ;;  %s2610_s2 = scalar_lea.vmem %s2073_s7, 128  ;;  %p2615_p13 = scmp.lt.s32.totalorder %s2073_s7, %s2073_s7 }
 0x5ae   :  { %v1966_v26 = vpop.permute.xlu0 %1965  ;;  %v1785_v14 = vrot.slane %v1784_v13, 4  ;;  %p2611_p12 = scmp.ne.s32.totalorder %s2073_s7, %s2610_s2  ;;  %p2616_p0 = scmp.lt.s32.totalorder %s2610_s2, %s2610_s2 }
 0x5af   :  { %v3490_v36 = vpop.permute.xlu1 %1931  ;;  %v1996_v12 = vsel %vm1560_vm5, %v1988_v16, %v1966_v26 }
 0x5b0   :  { %v2005_v49 = vsel %vm2002_vm8, %v1996_v12, 0.0  ;;  %v1786_v54 = vadd.f32 %v1785_v14, %v1784_v13  ;;  %p2617_p1 = por %p2616_p0, %p2615_p13 }
 0x5b1   :  { %2014 = vst.msk [vmem:[#allocation15 + $0x10] sm:$0xff] %vm2011_vm9, %v2005_v49 }
 0x5b2   :  { %v1970_v1 = vpop.permute.xlu0 %1969  ;;  %v1787_v35 = vrot.slane %v1786_v54, 2  ;;  %p2618_p2 = pnand %p2617_p1, %p2611_p12 }
 0x5b3   :  { %v1752_v31 = vpop.permute.xlu1 %1751  ;;  %v1998_v41 = vsel %vm1560_vm5, %v1990_v19, %v1970_v1 }
 0x5b4   :  { %v2007_v5 = vsel %vm2002_vm8, %v1998_v41, 0.0  ;;  %vm1770_vm10 = vcmp.eq.s32.totalorder %v1752_v31, 1  ;;  %v1788_v11 = vadd.f32 %v1787_v35, %v1786_v54 }
 0x5b5   :  { %2016 = vst.msk [vmem:[#allocation15 + $0x20] sm:$0xff] %vm2011_vm9, %v2007_v5  ;;  %v1778_v9 = vsel %vm1770_vm10, %v3235_v25, 0.0  ;;  %vm1856_vm10 = vcmask 1045509  }
 0x5b6   :  { %v1974_v58 = vpop.permute.xlu0 %1973  ;;  %v1798_v39 = vsel %vm157_vm1, %v1778_v9, 0.0  ;;  %v1789_v16 = vrot.slane %v1788_v11, 1 }
 0x5b7   :  { %v1755_v44 = vpop.permute.xlu1 %1754  ;;  %v2000_v6 = vsel %vm1560_vm5, %v1992_v3, %v1974_v58  ;;  %v1799_v50 = vrot.slane %v1798_v39, 4 }
 0x5b8   :  { %v2009_v38 = vsel %vm2002_vm8, %v2000_v6, 0.0  ;;  %vm1771_vm11 = vcmp.eq.s32.totalorder %v1755_v44, 1  ;;  %v1790_v58 = vadd.f32 %v1789_v16, %v1788_v11 }
 0x5b9   :  { %2018 = vst.msk [vmem:[#allocation15 + $0x30] sm:$0xff] %vm2011_vm9, %v2009_v38  ;;  %v1779_v52 = vsel %vm1771_vm11, %v3238_v23, 0.0  ;;  %v1800_v51 = vadd.f32 %v1799_v50, %v1798_v39  ;;  %v1987_v39 = vsel %vm1985_vm7, %v3470_v33, %v3490_v36  ;;  %vm1858_vm11 = vcmask 1046534  }
 0x5ba   :  { %v1805_v10 = vsel %vm157_vm1, %v1779_v52, 0.0  ;;  %v1989_v33 = vsel %vm1985_vm7, %v3472_v22, %v3484_v48 }
 0x5bb   :  { %v1749_v20 = vpop.permute.xlu1 %1748  ;;  %v1806_v34 = vrot.slane %v1805_v10, 4 }
 0x5bc   :  { %vm1769_vm12 = vcmp.eq.s32.totalorder %v1749_v20, 1 }
 0x5bd   :  { %v1777_v47 = vsel %vm1769_vm12, %v3224_v17, 0.0  ;;  %v1807_v53 = vadd.f32 %v1806_v34, %v1805_v10  ;;  %vm1860_vm12 = vcmask 1047559  }
 0x5be   :  { %v1791_v63 = vsel %vm157_vm1, %v1777_v47, 0.0 }
 0x5bf   :  { %v1792_v2 = vrot.slane %v1791_v63, 4  ;;  %v1764_v62 = vpop.permute.xlu1 %1763  ;;  %v1808_v4 = vrot.slane %v1807_v53, 2 }
 0x5c0   :  { %vm1774_vm13 = vcmp.eq.s32.totalorder %v1764_v62, 1 }
 0x5c1   :  { %v1793_v7 = vadd.f32 %v1792_v2, %v1791_v63  ;;  %v1782_v25 = vsel %vm1774_vm13, %v3262_v32, 0.0  ;;  %v1801_v32 = vrot.slane %v1800_v51, 2  ;;  %v1809_v1 = vadd.f32 %v1808_v4, %v1807_v53 }
 0x5c2   :  { %v1826_v46 = vsel %vm157_vm1, %v1782_v25, 0.0 }
 0x5c3   :  { %v1758_v8 = vpop.permute.xlu1 %1757  ;;  %v1794_v17 = vrot.slane %v1793_v7, 2  ;;  %v1827_v24 = vrot.slane %v1826_v46, 4  ;;  %v1802_v0 = vadd.f32 %v1801_v32, %v1800_v51  ;;  %v1810_v13 = vrot.slane %v1809_v1, 1 }
 0x5c4   :  { %vm1772_vm14 = vcmp.eq.s32.totalorder %v1758_v8, 1 }
 0x5c5   :  { %v1780_v23 = vsel %vm1772_vm14, %v3254_v56, 0.0  ;;  %v1795_v15 = vadd.f32 %v1794_v17, %v1793_v7  ;;  %v1828_v28 = vadd.f32 %v1827_v24, %v1826_v46  ;;  %v1803_v3 = vrot.slane %v1802_v0, 1 }
 0x5c6   :  { %v1812_v29 = vsel %vm157_vm1, %v1780_v23, 0.0  ;;  %v1811_v50 = vadd.f32 %v1810_v13, %v1809_v1 }
 0x5c7   :  { %v1813_v40 = vrot.slane %v1812_v29, 4  ;;  %v1767_v57 = vpop.permute.xlu1 %1766  ;;  %v1796_v37 = vrot.slane %v1795_v15, 1  ;;  %v1829_v12 = vrot.slane %v1828_v28, 2  ;;  %v1804_v47 = vadd.f32 %v1803_v3, %v1802_v0 }
 0x5c8   :  { %vm1775_vm15 = vcmp.eq.s32.totalorder %v1767_v57, 1 }
 0x5c9   :  { %v1814_v27 = vadd.f32 %v1813_v40, %v1812_v29  ;;  %v1783_v55 = vsel %vm1775_vm15, %v3277_v61, 0.0  ;;  %v1797_v31 = vadd.f32 %v1796_v37, %v1795_v15  ;;  %v1830_v6 = vadd.f32 %v1829_v12, %v1828_v28 }
 0x5ca   :  { %v1833_v59 = vsel %vm157_vm1, %v1783_v55, 0.0 }
 0x5cb   :  { %v1815_v60 = vrot.slane %v1814_v27, 2  ;;  %v1834_v18 = vrot.slane %v1833_v59, 4  ;;  %v1761_v56 = vpop.permute.xlu1 %1760  ;;  %v1849_v9 = vsel %vm1848_vm2, %v1797_v31, %v1790_v58  ;;  %v1831_v63 = vrot.slane %v1830_v6, 1 }
 0x5cc   :  { %vm1773_vm0 = vcmp.eq.s32.totalorder %v1761_v56, 1  ;;  %v1851_v52 = vsel %vm1850_vm3, %v1804_v47, %v1849_v9 }
 0x5cd   :  { %v1835_v42 = vadd.f32 %v1834_v18, %v1833_v59  ;;  %v1781_v26 = vsel %vm1773_vm0, %v3267_v21, 0.0  ;;  %v1816_v49 = vadd.f32 %v1815_v60, %v1814_v27  ;;  %v1853_v8 = vsel %vm1852_vm4, %v1811_v50, %v1851_v52 }
 0x5ce   :  { %v1819_v19 = vsel %vm157_vm1, %v1781_v26, 0.0  ;;  %v1832_v36 = vadd.f32 %v1831_v63, %v1830_v6 }
 0x5cf   :  { %v1940_v61 = vpop.permute.xlu1 %1939  ;;  %v1836_v41 = vrot.slane %v1835_v42, 2  ;;  %v1820_v5 = vrot.slane %v1819_v19, 4  ;;  %v1817_v43 = vrot.slane %v1816_v49, 1 }
 0x5d0   :  { %v1991_v57 = vsel %vm1985_vm7, %v3474_v45, %v1940_v61 }
 0x5d1   :  { %v1821_v44 = vadd.f32 %v1820_v5, %v1819_v19  ;;  %v1837_v21 = vadd.f32 %v1836_v41, %v1835_v42  ;;  %v1818_v2 = vadd.f32 %v1817_v43, %v1816_v49 }
 0x5d3   :  { %v1944_v38 = vpop.permute.xlu1 %1943  ;;  %v1822_v20 = vrot.slane %v1821_v44, 2  ;;  %v1838_v10 = vrot.slane %v1837_v21, 1  ;;  %v1855_v17 = vsel %vm1854_vm6, %v1818_v2, %v1853_v8 }
 0x5d5   :  { %v1823_v14 = vadd.f32 %v1822_v20, %v1821_v44  ;;  %v1839_v51 = vadd.f32 %v1838_v10, %v1837_v21 }
 0x5d7   :  { %v1964_v62 = vpop.permute.xlu1 %1963  ;;  %v1824_v7 = vrot.slane %v1823_v14, 1 }
 0x5d8   :  { %v1995_v25 = vsel %vm1560_vm5, %v1987_v39, %v1964_v62 }
 0x5d9   :  { %v2004_v54 = vsel %vm2002_vm8, %v1995_v25, 0.0  ;;  %v1825_v34 = vadd.f32 %v1824_v7, %v1823_v14 }
 0x5da   :  { %2013 = vst.msk [vmem:[#allocation15 + $0x8] sm:$0xff] %vm2011_vm9, %v2004_v54 }
 0x5db   :  { %v1968_v46 = vpop.permute.xlu1 %1967  ;;  %v1857_v35 = vsel %vm1856_vm10, %v1825_v34, %v1855_v17 }
 0x5dc   :  { %v1997_v23 = vsel %vm1560_vm5, %v1989_v33, %v1968_v46  ;;  %v1859_v24 = vsel %vm1858_vm11, %v1832_v36, %v1857_v35 }
 0x5dd   :  { %v2006_v29 = vsel %vm2002_vm8, %v1997_v23, 0.0  ;;  %v1861_v40 = vsel %vm1860_vm12, %v1839_v51, %v1859_v24 }
 0x5de   :  { %2015 = vst.msk [vmem:[#allocation15 + $0x18] sm:$0xff] %vm2011_vm9, %v2006_v29 }
 0x5df   :  { %v1972_v22 = vpop.permute.xlu1 %1971  ;;  %1863 = vst.msk [vmem:[#allocation18] sm:$0xff] %vm157_vm1, %v1861_v40 }
 0x5e0   :  { %v1999_v48 = vsel %vm1560_vm5, %v1991_v57, %v1972_v22 }
 0x5e1   :  { %2621 = shalt.err (!%p2618_p2)
}
 0x5e2   :  { %2075 = dma.vmem_to_hbm [thread:$0]  %s2073_s7, 128, %s3570_s18, [#allocation17]   ;;  %v2008_v53 = vsel %vm2002_vm8, %v1999_v48, 0.0  ;;  %v1993_v45 = vsel %vm1985_vm7, %v3477_v30, %v1944_v38 }
 0x5e3   :  { %s2689_s19 = smov [#allocation15]   ;;  %2017 = vst.msk [vmem:[#allocation15 + $0x28] sm:$0xff] %vm2011_vm9, %v2008_v53  ;;  %v1976_v15 = vpop.permute.xlu1 %1975 }
 0x5e4   :  { %s2049_s28 = sshll.u32 %s2689_s19, 4  ;;  %v2001_v32 = vsel %vm1560_vm5, %v1993_v45, %v1976_v15  ;;  %s2050_s28 = int_to_ptr.vmem [resolvable:$true] %s2049_s28 }
 0x5e5   :  { %v2010_v27 = vsel %vm2002_vm8, %v2001_v32, 0.0  ;;  %s2630_s4 = scalar_lea.vmem %s2050_s28, 1024  ;;  %p2635_p4 = scmp.lt.s32.totalorder %s2050_s28, %s2050_s28 }
 0x5e6   :  { %2019 = vst.msk [vmem:[#allocation15 + $0x38] sm:$0xff] %vm2011_vm9, %v2010_v27  ;;  %p2631_p3 = scmp.ne.s32.totalorder %s2050_s28, %s2630_s4  ;;  %p2636_p5 = scmp.lt.s32.totalorder %s2630_s4, %s2630_s4 }
 0x5e8   :  { %p2637_p6 = por %p2636_p5, %p2635_p4 }
 0x5ea   :  { %p2638_p7 = pnand %p2637_p6, %p2631_p3 }
 0x5ec   :  { %2641 = shalt.err (!%p2638_p7)
}
 0x5ed   :  { %s3581_s18 = smov 128  }
 0x5ee   :  { %2055 = dma.vmem_to_hbm [thread:$0]  %s2050_s28, 1024, %s3568_s16, [#allocation14], %s3581_s18, %s3581_s18, %s2664_s1  }
 0x5ef   :  { %2656 = dma.done.wait [#allocation5], 512  }
 0x5f0   :  { %2657 = vsyncadd [#allocation5], 4294966784 }
 0x5f1   :  { %2658 = dma.done.wait [#allocation14], 1536  }
 0x5f2   :  { %2659 = vsyncadd [#allocation14], 4294965760 }
 0x5f3   :  { %2660 = dma.done.wait [#allocation17], 256  }
 0x5f4   :  { %2661 = vsyncadd [#allocation17], 4294967040 }
 0x5f5   :  { %2091 = vsyncpa [#allocation4], 1 }
 0x5f6   :  { %2092 = vsyncpa [#allocation7], 1 }
 0x5f7   :  { %2093 = vsyncpa [#allocation10], 1 }
 0x5f8   :  { %2094 = vsyncpa [#allocation5], 1 }
 0x5f9   :  { %2095 = vsyncpa [#allocation14], 1 }
 0x5fa   :  { %2096 = vsyncpa [#allocation17], 1 }

</bundles_post_ra>
